<compile_context>
chip_gen: v6e
topology: v6e:2x2x1
jax: 0.10.0
libtpu: 0.0.40
codegen_flags: <defaults>
</compile_context>

<pallas_src>
import functools

import jax
import jax.numpy as jnp
from jax.experimental import pallas as pl
from jax.experimental.pallas import tpu as pltpu


def _vflip3_kernel(hb, flag_ref, ct_ref, mri_ref, mask_ref, ct_o, mri_o, mask_o):
    # flag_ref: SMEM scalar-prefetch, shape (1,), int32 (1 => flip, 0 => identity)
    # *_ref / *_o: VMEM blocks of shape (1, C, hb, W)
    flip = flag_ref[0] > 0

    @pl.when(flip)
    def _():
        # The H-block index was already mirrored in the index_map, so reversing
        # the hb rows inside the block completes the full-H flip.  Static
        # sublane slices lower to simple masked loads/stores (no MXU/XLU cost).
        for i in range(hb):
            j = hb - 1 - i
            ct_o[:, :, i:i + 1, :] = ct_ref[:, :, j:j + 1, :]
            mri_o[:, :, i:i + 1, :] = mri_ref[:, :, j:j + 1, :]
            mask_o[:, :, i:i + 1, :] = mask_ref[:, :, j:j + 1, :]

    @pl.when(jnp.logical_not(flip))
    def _():
        # No flip: dense whole-block copies only.
        ct_o[...] = ct_ref[...]
        mri_o[...] = mri_ref[...]
        mask_o[...] = mask_ref[...]


def _pick_h_block(h, max_rows=32):
    """Largest sublane-aligned (multiple of 8) H-block that divides H, capped
    at max_rows to bound unrolled copy count / compile time.  If H is not a
    multiple of 8, fall back to a full-H block (allowed by the tile rule)."""
    if h % 8 != 0:
        return h
    hb = min(h, max_rows)
    hb -= hb % 8
    while h % hb != 0:
        hb -= 8
    return hb


def random_vflip_pallas(flag, ct, mri, mask):
    """Conditionally (flag != 0) flip ct/mri/mask (NCHW) along H in one fused kernel."""
    N, c_ct, H, W = ct.shape
    assert mri.shape[0] == N and mri.shape[2:] == (H, W)
    assert mask.shape[0] == N and mask.shape[2:] == (H, W)
    c_mri = mri.shape[1]
    c_mask = mask.shape[1]

    hb = _pick_h_block(H)
    n_hb = H // hb

    def in_map(n, h, flag_ref):
        # Mirror the H-block index when flipping; identity otherwise.
        src = jnp.where(flag_ref[0] > 0, n_hb - 1 - h, h)
        return (n, 0, src, 0)

    def out_map(n, h, flag_ref):
        return (n, 0, h, 0)

    def specs(c):
        return (pl.BlockSpec((1, c, hb, W), in_map),
                pl.BlockSpec((1, c, hb, W), out_map))

    ct_in, ct_out = specs(c_ct)
    mri_in, mri_out = specs(c_mri)
    mask_in, mask_out = specs(c_mask)

    grid_spec = pltpu.PrefetchScalarGridSpec(
        num_scalar_prefetch=1,
        grid=(N, n_hb),
        in_specs=[ct_in, mri_in, mask_in],
        out_specs=[ct_out, mri_out, mask_out],
    )

    kernel = functools.partial(_vflip3_kernel, hb)

    return pl.pallas_call(
        kernel,
        out_shape=(jax.ShapeDtypeStruct(ct.shape, ct.dtype),
                   jax.ShapeDtypeStruct(mri.shape, mri.dtype),
                   jax.ShapeDtypeStruct(mask.shape, mask.dtype)),
        grid_spec=grid_spec,
        compiler_params=pltpu.CompilerParams(
            dimension_semantics=("parallel", "parallel")),
    )(flag, ct, mri, mask)


class RandomVerticalFlipPallas:
    """JAX/Pallas equivalent of the PyTorch RandomVerticalFlip(p) module."""

    def __init__(self, p=0.5):
        self.p = p

    def __call__(self, key, ct, mri, mask):
        # Single Bernoulli draw shared by all three tensors (torch.rand(1) < p).
        flip = (jax.random.uniform(key, ()) < self.p).astype(jnp.int32)
        flag = jnp.reshape(flip, (1,))
        return random_vflip_pallas(flag, ct, mri, mask)


if __name__ == "__main__":
    key = jax.random.PRNGKey(0)
    k_ct, k_mri, k_mask, k_flip = jax.random.split(key, 4)

    ct = jax.random.normal(k_ct, (2, 4, 16, 16), dtype=jnp.float32)
    mri = jax.random.normal(k_mri, (2, 4, 16, 16), dtype=jnp.float32)
    mask = (jax.random.uniform(k_mask, (2, 1, 16, 16)) > 0.5).astype(jnp.float32)

    # Deterministic checks of both branches.
    one = jnp.ones((1,), jnp.int32)
    zero = jnp.zeros((1,), jnp.int32)

    ct_f, mri_f, mask_f = random_vflip_pallas(one, ct, mri, mask)
    jax.block_until_ready((ct_f, mri_f, mask_f))
    assert jnp.array_equal(ct_f, jnp.flip(ct, axis=2))
    assert jnp.array_equal(mri_f, jnp.flip(mri, axis=2))
    assert jnp.array_equal(mask_f, jnp.flip(mask, axis=2))

    ct_n, mri_n, mask_n = random_vflip_pallas(zero, ct, mri, mask)
    jax.block_until_ready((ct_n, mri_n, mask_n))
    assert jnp.array_equal(ct_n, ct)
    assert jnp.array_equal(mri_n, mri)
    assert jnp.array_equal(mask_n, mask)

    # Module path: same random decision as the pure-JAX reference.
    module = RandomVerticalFlipPallas(p=0.5)
    ct_o, mri_o, mask_o = module(k_flip, ct, mri, mask)
    jax.block_until_ready((ct_o, mri_o, mask_o))
    flip = bool(jax.random.uniform(k_flip, ()) < 0.5)
    ref = (lambda t: jnp.flip(t, axis=2) if flip else t)
    assert jnp.array_equal(ct_o, ref(ct))
    assert jnp.array_equal(mri_o, ref(mri))
    assert jnp.array_equal(mask_o, ref(mask))

    print("KERNEL_OK")
</pallas_src>

<mosaic_0001>
module attributes {stable_mosaic.version = 11 : i64} {
  func.func @_vflip3_kernel(%arg0: i32, %arg1: i32, %arg2: memref<1xi32, #tpu.memory_space<smem>>, %arg3: memref<1x4x16x16xf32, #tpu.memory_space<vmem>>, %arg4: memref<1x4x16x16xf32, #tpu.memory_space<vmem>>, %arg5: memref<1x1x16x16xf32, #tpu.memory_space<vmem>>, %arg6: memref<1x4x16x16xf32, #tpu.memory_space<vmem>>, %arg7: memref<1x4x16x16xf32, #tpu.memory_space<vmem>>, %arg8: memref<1x1x16x16xf32, #tpu.memory_space<vmem>>) attributes {dimension_semantics = [#tpu.dimension_semantics<parallel>, #tpu.dimension_semantics<parallel>], iteration_bounds = array<i64: 2, 1>, scalar_prefetch = 1 : i64, scratch_operands = 0 : i64, tpu.core_type = #tpu.core_type<tc>, window_params = [{transform_indices = @transform_0, window_bounds = array<i64: 1, 4, 16, 16>}, {transform_indices = @transform_1, window_bounds = array<i64: 1, 4, 16, 16>}, {transform_indices = @transform_2, window_bounds = array<i64: 1, 1, 16, 16>}, {transform_indices = @transform_3, window_bounds = array<i64: 1, 4, 16, 16>}, {transform_indices = @transform_4, window_bounds = array<i64: 1, 4, 16, 16>}, {transform_indices = @transform_5, window_bounds = array<i64: 1, 1, 16, 16>}]} {
    %c0 = arith.constant 0 : index
    %0 = memref.load %arg2[%c0] : memref<1xi32, #tpu.memory_space<smem>>
    %c0_i32 = arith.constant 0 : i32
    %1 = arith.cmpi sgt, %0, %c0_i32 : i32
    %2 = arith.extui %1 : i1 to i32
    %c0_i32_0 = arith.constant 0 : i32
    %3 = arith.cmpi ne, %2, %c0_i32_0 : i32
    scf.if %3 {
      %c0_2 = arith.constant 0 : index
      %c0_3 = arith.constant 0 : index
      %c15 = arith.constant 15 : index
      %c0_4 = arith.constant 0 : index
      %7 = vector.load %arg3[%c0_2, %c0_3, %c15, %c0_4] : memref<1x4x16x16xf32, #tpu.memory_space<vmem>>, vector<1x4x1x16xf32>
      %c0_5 = arith.constant 0 : index
      %c0_6 = arith.constant 0 : index
      %c0_7 = arith.constant 0 : index
      %c0_8 = arith.constant 0 : index
      %8 = vector.load %arg6[%c0_5, %c0_6, %c0_7, %c0_8] : memref<1x4x16x16xf32, #tpu.memory_space<vmem>>, vector<1x4x1x16xf32>
      tpu.vector_store %arg6[%c0_5, %c0_6, %c0_7, %c0_8], %7 {strides = array<i32>} : memref<1x4x16x16xf32, #tpu.memory_space<vmem>>, vector<1x4x1x16xf32>,
      %c0_9 = arith.constant 0 : index
      %c0_10 = arith.constant 0 : index
      %c15_11 = arith.constant 15 : index
      %c0_12 = arith.constant 0 : index
      %9 = vector.load %arg4[%c0_9, %c0_10, %c15_11, %c0_12] : memref<1x4x16x16xf32, #tpu.memory_space<vmem>>, vector<1x4x1x16xf32>
      %c0_13 = arith.constant 0 : index
      %c0_14 = arith.constant 0 : index
      %c0_15 = arith.constant 0 : index
      %c0_16 = arith.constant 0 : index
      %10 = vector.load %arg7[%c0_13, %c0_14, %c0_15, %c0_16] : memref<1x4x16x16xf32, #tpu.memory_space<vmem>>, vector<1x4x1x16xf32>
      tpu.vector_store %arg7[%c0_13, %c0_14, %c0_15, %c0_16], %9 {strides = array<i32>} : memref<1x4x16x16xf32, #tpu.memory_space<vmem>>, vector<1x4x1x16xf32>,
      %c0_17 = arith.constant 0 : index
      %c0_18 = arith.constant 0 : index
      %c15_19 = arith.constant 15 : index
      %c0_20 = arith.constant 0 : index
      %11 = vector.load %arg5[%c0_17, %c0_18, %c15_19, %c0_20] : memref<1x1x16x16xf32, #tpu.memory_space<vmem>>, vector<1x1x1x16xf32>
      %c0_21 = arith.constant 0 : index
      %c0_22 = arith.constant 0 : index
      %c0_23 = arith.constant 0 : index
      %c0_24 = arith.constant 0 : index
      %12 = vector.load %arg8[%c0_21, %c0_22, %c0_23, %c0_24] : memref<1x1x16x16xf32, #tpu.memory_space<vmem>>, vector<1x1x1x16xf32>
      tpu.vector_store %arg8[%c0_21, %c0_22, %c0_23, %c0_24], %11 {strides = array<i32>} : memref<1x1x16x16xf32, #tpu.memory_space<vmem>>, vector<1x1x1x16xf32>,
      %c0_25 = arith.constant 0 : index
      %c0_26 = arith.constant 0 : index
      %c14 = arith.constant 14 : index
      %c0_27 = arith.constant 0 : index
      %13 = vector.load %arg3[%c0_25, %c0_26, %c14, %c0_27] : memref<1x4x16x16xf32, #tpu.memory_space<vmem>>, vector<1x4x1x16xf32>
      %c0_28 = arith.constant 0 : index
      %c0_29 = arith.constant 0 : index
      %c1 = arith.constant 1 : index
      %c0_30 = arith.constant 0 : index
      %14 = vector.load %arg6[%c0_28, %c0_29, %c1, %c0_30] : memref<1x4x16x16xf32, #tpu.memory_space<vmem>>, vector<1x4x1x16xf32>
      tpu.vector_store %arg6[%c0_28, %c0_29, %c1, %c0_30], %13 {strides = array<i32>} : memref<1x4x16x16xf32, #tpu.memory_space<vmem>>, vector<1x4x1x16xf32>,
      %c0_31 = arith.constant 0 : index
      %c0_32 = arith.constant 0 : index
      %c14_33 = arith.constant 14 : index
      %c0_34 = arith.constant 0 : index
      %15 = vector.load %arg4[%c0_31, %c0_32, %c14_33, %c0_34] : memref<1x4x16x16xf32, #tpu.memory_space<vmem>>, vector<1x4x1x16xf32>
      %c0_35 = arith.constant 0 : index
      %c0_36 = arith.constant 0 : index
      %c1_37 = arith.constant 1 : index
      %c0_38 = arith.constant 0 : index
      %16 = vector.load %arg7[%c0_35, %c0_36, %c1_37, %c0_38] : memref<1x4x16x16xf32, #tpu.memory_space<vmem>>, vector<1x4x1x16xf32>
      tpu.vector_store %arg7[%c0_35, %c0_36, %c1_37, %c0_38], %15 {strides = array<i32>} : memref<1x4x16x16xf32, #tpu.memory_space<vmem>>, vector<1x4x1x16xf32>,
      %c0_39 = arith.constant 0 : index
      %c0_40 = arith.constant 0 : index
      %c14_41 = arith.constant 14 : index
      %c0_42 = arith.constant 0 : index
      %17 = vector.load %arg5[%c0_39, %c0_40, %c14_41, %c0_42] : memref<1x1x16x16xf32, #tpu.memory_space<vmem>>, vector<1x1x1x16xf32>
      %c0_43 = arith.constant 0 : index
      %c0_44 = arith.constant 0 : index
      %c1_45 = arith.constant 1 : index
      %c0_46 = arith.constant 0 : index
      %18 = vector.load %arg8[%c0_43, %c0_44, %c1_45, %c0_46] : memref<1x1x16x16xf32, #tpu.memory_space<vmem>>, vector<1x1x1x16xf32>
      tpu.vector_store %arg8[%c0_43, %c0_44, %c1_45, %c0_46], %17 {strides = array<i32>} : memref<1x1x16x16xf32, #tpu.memory_space<vmem>>, vector<1x1x1x16xf32>,
      %c0_47 = arith.constant 0 : index
      %c0_48 = arith.constant 0 : index
      %c13 = arith.constant 13 : index
      %c0_49 = arith.constant 0 : index
      %19 = vector.load %arg3[%c0_47, %c0_48, %c13, %c0_49] : memref<1x4x16x16xf32, #tpu.memory_space<vmem>>, vector<1x4x1x16xf32>
      %c0_50 = arith.constant 0 : index
      %c0_51 = arith.constant 0 : index
      %c2 = arith.constant 2 : index
      %c0_52 = arith.constant 0 : index
      %20 = vector.load %arg6[%c0_50, %c0_51, %c2, %c0_52] : memref<1x4x16x16xf32, #tpu.memory_space<vmem>>, vector<1x4x1x16xf32>
      tpu.vector_store %arg6[%c0_50, %c0_51, %c2, %c0_52], %19 {strides = array<i32>} : memref<1x4x16x16xf32, #tpu.memory_space<vmem>>, vector<1x4x1x16xf32>,
      %c0_53 = arith.constant 0 : index
      %c0_54 = arith.constant 0 : index
      %c13_55 = arith.constant 13 : index
      %c0_56 = arith.constant 0 : index
      %21 = vector.load %arg4[%c0_53, %c0_54, %c13_55, %c0_56] : memref<1x4x16x16xf32, #tpu.memory_space<vmem>>, vector<1x4x1x16xf32>
      %c0_57 = arith.constant 0 : index
      %c0_58 = arith.constant 0 : index
      %c2_59 = arith.constant 2 : index
      %c0_60 = arith.constant 0 : index
      %22 = vector.load %arg7[%c0_57, %c0_58, %c2_59, %c0_60] : memref<1x4x16x16xf32, #tpu.memory_space<vmem>>, vector<1x4x1x16xf32>
      tpu.vector_store %arg7[%c0_57, %c0_58, %c2_59, %c0_60], %21 {strides = array<i32>} : memref<1x4x16x16xf32, #tpu.memory_space<vmem>>, vector<1x4x1x16xf32>,
      %c0_61 = arith.constant 0 : index
      %c0_62 = arith.constant 0 : index
      %c13_63 = arith.constant 13 : index
      %c0_64 = arith.constant 0 : index
      %23 = vector.load %arg5[%c0_61, %c0_62, %c13_63, %c0_64] : memref<1x1x16x16xf32, #tpu.memory_space<vmem>>, vector<1x1x1x16xf32>
      %c0_65 = arith.constant 0 : index
      %c0_66 = arith.constant 0 : index
      %c2_67 = arith.constant 2 : index
      %c0_68 = arith.constant 0 : index
      %24 = vector.load %arg8[%c0_65, %c0_66, %c2_67, %c0_68] : memref<1x1x16x16xf32, #tpu.memory_space<vmem>>, vector<1x1x1x16xf32>
      tpu.vector_store %arg8[%c0_65, %c0_66, %c2_67, %c0_68], %23 {strides = array<i32>} : memref<1x1x16x16xf32, #tpu.memory_space<vmem>>, vector<1x1x1x16xf32>,
      %c0_69 = arith.constant 0 : index
      %c0_70 = arith.constant 0 : index
      %c12 = arith.constant 12 : index
      %c0_71 = arith.constant 0 : index
      %25 = vector.load %arg3[%c0_69, %c0_70, %c12, %c0_71] : memref<1x4x16x16xf32, #tpu.memory_space<vmem>>, vector<1x4x1x16xf32>
      %c0_72 = arith.constant 0 : index
      %c0_73 = arith.constant 0 : index
      %c3 = arith.constant 3 : index
      %c0_74 = arith.constant 0 : index
      %26 = vector.load %arg6[%c0_72, %c0_73, %c3, %c0_74] : memref<1x4x16x16xf32, #tpu.memory_space<vmem>>, vector<1x4x1x16xf32>
      tpu.vector_store %arg6[%c0_72, %c0_73, %c3, %c0_74], %25 {strides = array<i32>} : memref<1x4x16x16xf32, #tpu.memory_space<vmem>>, vector<1x4x1x16xf32>,
      %c0_75 = arith.constant 0 : index
      %c0_76 = arith.constant 0 : index
      %c12_77 = arith.constant 12 : index
      %c0_78 = arith.constant 0 : index
      %27 = vector.load %arg4[%c0_75, %c0_76, %c12_77, %c0_78] : memref<1x4x16x16xf32, #tpu.memory_space<vmem>>, vector<1x4x1x16xf32>
      %c0_79 = arith.constant 0 : index
      %c0_80 = arith.constant 0 : index
      %c3_81 = arith.constant 3 : index
      %c0_82 = arith.constant 0 : index
      %28 = vector.load %arg7[%c0_79, %c0_80, %c3_81, %c0_82] : memref<1x4x16x16xf32, #tpu.memory_space<vmem>>, vector<1x4x1x16xf32>
      tpu.vector_store %arg7[%c0_79, %c0_80, %c3_81, %c0_82], %27 {strides = array<i32>} : memref<1x4x16x16xf32, #tpu.memory_space<vmem>>, vector<1x4x1x16xf32>,
      %c0_83 = arith.constant 0 : index
      %c0_84 = arith.constant 0 : index
      %c12_85 = arith.constant 12 : index
      %c0_86 = arith.constant 0 : index
      %29 = vector.load %arg5[%c0_83, %c0_84, %c12_85, %c0_86] : memref<1x1x16x16xf32, #tpu.memory_space<vmem>>, vector<1x1x1x16xf32>
      %c0_87 = arith.constant 0 : index
      %c0_88 = arith.constant 0 : index
      %c3_89 = arith.constant 3 : index
      %c0_90 = arith.constant 0 : index
      %30 = vector.load %arg8[%c0_87, %c0_88, %c3_89, %c0_90] : memref<1x1x16x16xf32, #tpu.memory_space<vmem>>, vector<1x1x1x16xf32>
      tpu.vector_store %arg8[%c0_87, %c0_88, %c3_89, %c0_90], %29 {strides = array<i32>} : memref<1x1x16x16xf32, #tpu.memory_space<vmem>>, vector<1x1x1x16xf32>,
      %c0_91 = arith.constant 0 : index
      %c0_92 = arith.constant 0 : index
      %c11 = arith.constant 11 : index
      %c0_93 = arith.constant 0 : index
      %31 = vector.load %arg3[%c0_91, %c0_92, %c11, %c0_93] : memref<1x4x16x16xf32, #tpu.memory_space<vmem>>, vector<1x4x1x16xf32>
      %c0_94 = arith.constant 0 : index
      %c0_95 = arith.constant 0 : index
      %c4 = arith.constant 4 : index
      %c0_96 = arith.constant 0 : index
      %32 = vector.load %arg6[%c0_94, %c0_95, %c4, %c0_96] : memref<1x4x16x16xf32, #tpu.memory_space<vmem>>, vector<1x4x1x16xf32>
      tpu.vector_store %arg6[%c0_94, %c0_95, %c4, %c0_96], %31 {strides = array<i32>} : memref<1x4x16x16xf32, #tpu.memory_space<vmem>>, vector<1x4x1x16xf32>,
      %c0_97 = arith.constant 0 : index
      %c0_98 = arith.constant 0 : index
      %c11_99 = arith.constant 11 : index
      %c0_100 = arith.constant 0 : index
      %33 = vector.load %arg4[%c0_97, %c0_98, %c11_99, %c0_100] : memref<1x4x16x16xf32, #tpu.memory_space<vmem>>, vector<1x4x1x16xf32>
      %c0_101 = arith.constant 0 : index
      %c0_102 = arith.constant 0 : index
      %c4_103 = arith.constant 4 : index
      %c0_104 = arith.constant 0 : index
      %34 = vector.load %arg7[%c0_101, %c0_102, %c4_103, %c0_104] : memref<1x4x16x16xf32, #tpu.memory_space<vmem>>, vector<1x4x1x16xf32>
      tpu.vector_store %arg7[%c0_101, %c0_102, %c4_103, %c0_104], %33 {strides = array<i32>} : memref<1x4x16x16xf32, #tpu.memory_space<vmem>>, vector<1x4x1x16xf32>,
      %c0_105 = arith.constant 0 : index
      %c0_106 = arith.constant 0 : index
      %c11_107 = arith.constant 11 : index
      %c0_108 = arith.constant 0 : index
      %35 = vector.load %arg5[%c0_105, %c0_106, %c11_107, %c0_108] : memref<1x1x16x16xf32, #tpu.memory_space<vmem>>, vector<1x1x1x16xf32>
      %c0_109 = arith.constant 0 : index
      %c0_110 = arith.constant 0 : index
      %c4_111 = arith.constant 4 : index
      %c0_112 = arith.constant 0 : index
      %36 = vector.load %arg8[%c0_109, %c0_110, %c4_111, %c0_112] : memref<1x1x16x16xf32, #tpu.memory_space<vmem>>, vector<1x1x1x16xf32>
      tpu.vector_store %arg8[%c0_109, %c0_110, %c4_111, %c0_112], %35 {strides = array<i32>} : memref<1x1x16x16xf32, #tpu.memory_space<vmem>>, vector<1x1x1x16xf32>,
      %c0_113 = arith.constant 0 : index
      %c0_114 = arith.constant 0 : index
      %c10 = arith.constant 10 : index
      %c0_115 = arith.constant 0 : index
      %37 = vector.load %arg3[%c0_113, %c0_114, %c10, %c0_115] : memref<1x4x16x16xf32, #tpu.memory_space<vmem>>, vector<1x4x1x16xf32>
      %c0_116 = arith.constant 0 : index
      %c0_117 = arith.constant 0 : index
      %c5 = arith.constant 5 : index
      %c0_118 = arith.constant 0 : index
      %38 = vector.load %arg6[%c0_116, %c0_117, %c5, %c0_118] : memref<1x4x16x16xf32, #tpu.memory_space<vmem>>, vector<1x4x1x16xf32>
      tpu.vector_store %arg6[%c0_116, %c0_117, %c5, %c0_118], %37 {strides = array<i32>} : memref<1x4x16x16xf32, #tpu.memory_space<vmem>>, vector<1x4x1x16xf32>,
      %c0_119 = arith.constant 0 : index
      %c0_120 = arith.constant 0 : index
      %c10_121 = arith.constant 10 : index
      %c0_122 = arith.constant 0 : index
      %39 = vector.load %arg4[%c0_119, %c0_120, %c10_121, %c0_122] : memref<1x4x16x16xf32, #tpu.memory_space<vmem>>, vector<1x4x1x16xf32>
      %c0_123 = arith.constant 0 : index
      %c0_124 = arith.constant 0 : index
      %c5_125 = arith.constant 5 : index
      %c0_126 = arith.constant 0 : index
      %40 = vector.load %arg7[%c0_123, %c0_124, %c5_125, %c0_126] : memref<1x4x16x16xf32, #tpu.memory_space<vmem>>, vector<1x4x1x16xf32>
      tpu.vector_store %arg7[%c0_123, %c0_124, %c5_125, %c0_126], %39 {strides = array<i32>} : memref<1x4x16x16xf32, #tpu.memory_space<vmem>>, vector<1x4x1x16xf32>,
      %c0_127 = arith.constant 0 : index
      %c0_128 = arith.constant 0 : index
      %c10_129 = arith.constant 10 : index
      %c0_130 = arith.constant 0 : index
      %41 = vector.load %arg5[%c0_127, %c0_128, %c10_129, %c0_130] : memref<1x1x16x16xf32, #tpu.memory_space<vmem>>, vector<1x1x1x16xf32>
      %c0_131 = arith.constant 0 : index
      %c0_132 = arith.constant 0 : index
      %c5_133 = arith.constant 5 : index
      %c0_134 = arith.constant 0 : index
      %42 = vector.load %arg8[%c0_131, %c0_132, %c5_133, %c0_134] : memref<1x1x16x16xf32, #tpu.memory_space<vmem>>, vector<1x1x1x16xf32>
      tpu.vector_store %arg8[%c0_131, %c0_132, %c5_133, %c0_134], %41 {strides = array<i32>} : memref<1x1x16x16xf32, #tpu.memory_space<vmem>>, vector<1x1x1x16xf32>,
      %c0_135 = arith.constant 0 : index
      %c0_136 = arith.constant 0 : index
      %c9 = arith.constant 9 : index
      %c0_137 = arith.constant 0 : index
      %43 = vector.load %arg3[%c0_135, %c0_136, %c9, %c0_137] : memref<1x4x16x16xf32, #tpu.memory_space<vmem>>, vector<1x4x1x16xf32>
      %c0_138 = arith.constant 0 : index
      %c0_139 = arith.constant 0 : index
      %c6 = arith.constant 6 : index
      %c0_140 = arith.constant 0 : index
      %44 = vector.load %arg6[%c0_138, %c0_139, %c6, %c0_140] : memref<1x4x16x16xf32, #tpu.memory_space<vmem>>, vector<1x4x1x16xf32>
      tpu.vector_store %arg6[%c0_138, %c0_139, %c6, %c0_140], %43 {strides = array<i32>} : memref<1x4x16x16xf32, #tpu.memory_space<vmem>>, vector<1x4x1x16xf32>,
      %c0_141 = arith.constant 0 : index
      %c0_142 = arith.constant 0 : index
      %c9_143 = arith.constant 9 : index
      %c0_144 = arith.constant 0 : index
      %45 = vector.load %arg4[%c0_141, %c0_142, %c9_143, %c0_144] : memref<1x4x16x16xf32, #tpu.memory_space<vmem>>, vector<1x4x1x16xf32>
      %c0_145 = arith.constant 0 : index
      %c0_146 = arith.constant 0 : index
      %c6_147 = arith.constant 6 : index
      %c0_148 = arith.constant 0 : index
      %46 = vector.load %arg7[%c0_145, %c0_146, %c6_147, %c0_148] : memref<1x4x16x16xf32, #tpu.memory_space<vmem>>, vector<1x4x1x16xf32>
      tpu.vector_store %arg7[%c0_145, %c0_146, %c6_147, %c0_148], %45 {strides = array<i32>} : memref<1x4x16x16xf32, #tpu.memory_space<vmem>>, vector<1x4x1x16xf32>,
      %c0_149 = arith.constant 0 : index
      %c0_150 = arith.constant 0 : index
      %c9_151 = arith.constant 9 : index
      %c0_152 = arith.constant 0 : index
      %47 = vector.load %arg5[%c0_149, %c0_150, %c9_151, %c0_152] : memref<1x1x16x16xf32, #tpu.memory_space<vmem>>, vector<1x1x1x16xf32>
      %c0_153 = arith.constant 0 : index
      %c0_154 = arith.constant 0 : index
      %c6_155 = arith.constant 6 : index
      %c0_156 = arith.constant 0 : index
      %48 = vector.load %arg8[%c0_153, %c0_154, %c6_155, %c0_156] : memref<1x1x16x16xf32, #tpu.memory_space<vmem>>, vector<1x1x1x16xf32>
      tpu.vector_store %arg8[%c0_153, %c0_154, %c6_155, %c0_156], %47 {strides = array<i32>} : memref<1x1x16x16xf32, #tpu.memory_space<vmem>>, vector<1x1x1x16xf32>,
      %c0_157 = arith.constant 0 : index
      %c0_158 = arith.constant 0 : index
      %c8 = arith.constant 8 : index
      %c0_159 = arith.constant 0 : index
      %49 = vector.load %arg3[%c0_157, %c0_158, %c8, %c0_159] : memref<1x4x16x16xf32, #tpu.memory_space<vmem>>, vector<1x4x1x16xf32>
      %c0_160 = arith.constant 0 : index
      %c0_161 = arith.constant 0 : index
      %c7 = arith.constant 7 : index
      %c0_162 = arith.constant 0 : index
      %50 = vector.load %arg6[%c0_160, %c0_161, %c7, %c0_162] : memref<1x4x16x16xf32, #tpu.memory_space<vmem>>, vector<1x4x1x16xf32>
      tpu.vector_store %arg6[%c0_160, %c0_161, %c7, %c0_162], %49 {strides = array<i32>} : memref<1x4x16x16xf32, #tpu.memory_space<vmem>>, vector<1x4x1x16xf32>,
      %c0_163 = arith.constant 0 : index
      %c0_164 = arith.constant 0 : index
      %c8_165 = arith.constant 8 : index
      %c0_166 = arith.constant 0 : index
      %51 = vector.load %arg4[%c0_163, %c0_164, %c8_165, %c0_166] : memref<1x4x16x16xf32, #tpu.memory_space<vmem>>, vector<1x4x1x16xf32>
      %c0_167 = arith.constant 0 : index
      %c0_168 = arith.constant 0 : index
      %c7_169 = arith.constant 7 : index
      %c0_170 = arith.constant 0 : index
      %52 = vector.load %arg7[%c0_167, %c0_168, %c7_169, %c0_170] : memref<1x4x16x16xf32, #tpu.memory_space<vmem>>, vector<1x4x1x16xf32>
      tpu.vector_store %arg7[%c0_167, %c0_168, %c7_169, %c0_170], %51 {strides = array<i32>} : memref<1x4x16x16xf32, #tpu.memory_space<vmem>>, vector<1x4x1x16xf32>,
      %c0_171 = arith.constant 0 : index
      %c0_172 = arith.constant 0 : index
      %c8_173 = arith.constant 8 : index
      %c0_174 = arith.constant 0 : index
      %53 = vector.load %arg5[%c0_171, %c0_172, %c8_173, %c0_174] : memref<1x1x16x16xf32, #tpu.memory_space<vmem>>, vector<1x1x1x16xf32>
      %c0_175 = arith.constant 0 : index
      %c0_176 = arith.constant 0 : index
      %c7_177 = arith.constant 7 : index
      %c0_178 = arith.constant 0 : index
      %54 = vector.load %arg8[%c0_175, %c0_176, %c7_177, %c0_178] : memref<1x1x16x16xf32, #tpu.memory_space<vmem>>, vector<1x1x1x16xf32>
      tpu.vector_store %arg8[%c0_175, %c0_176, %c7_177, %c0_178], %53 {strides = array<i32>} : memref<1x1x16x16xf32, #tpu.memory_space<vmem>>, vector<1x1x1x16xf32>,
      %c0_179 = arith.constant 0 : index
      %c0_180 = arith.constant 0 : index
      %c7_181 = arith.constant 7 : index
      %c0_182 = arith.constant 0 : index
      %55 = vector.load %arg3[%c0_179, %c0_180, %c7_181, %c0_182] : memref<1x4x16x16xf32, #tpu.memory_space<vmem>>, vector<1x4x1x16xf32>
      %c0_183 = arith.constant 0 : index
      %c0_184 = arith.constant 0 : index
      %c8_185 = arith.constant 8 : index
      %c0_186 = arith.constant 0 : index
      %56 = vector.load %arg6[%c0_183, %c0_184, %c8_185, %c0_186] : memref<1x4x16x16xf32, #tpu.memory_space<vmem>>, vector<1x4x1x16xf32>
      tpu.vector_store %arg6[%c0_183, %c0_184, %c8_185, %c0_186], %55 {strides = array<i32>} : memref<1x4x16x16xf32, #tpu.memory_space<vmem>>, vector<1x4x1x16xf32>,
      %c0_187 = arith.constant 0 : index
      %c0_188 = arith.constant 0 : index
      %c7_189 = arith.constant 7 : index
      %c0_190 = arith.constant 0 : index
      %57 = vector.load %arg4[%c0_187, %c0_188, %c7_189, %c0_190] : memref<1x4x16x16xf32, #tpu.memory_space<vmem>>, vector<1x4x1x16xf32>
      %c0_191 = arith.constant 0 : index
      %c0_192 = arith.constant 0 : index
      %c8_193 = arith.constant 8 : index
      %c0_194 = arith.constant 0 : index
      %58 = vector.load %arg7[%c0_191, %c0_192, %c8_193, %c0_194] : memref<1x4x16x16xf32, #tpu.memory_space<vmem>>, vector<1x4x1x16xf32>
      tpu.vector_store %arg7[%c0_191, %c0_192, %c8_193, %c0_194], %57 {strides = array<i32>} : memref<1x4x16x16xf32, #tpu.memory_space<vmem>>, vector<1x4x1x16xf32>,
      %c0_195 = arith.constant 0 : index
      %c0_196 = arith.constant 0 : index
      %c7_197 = arith.constant 7 : index
      %c0_198 = arith.constant 0 : index
      %59 = vector.load %arg5[%c0_195, %c0_196, %c7_197, %c0_198] : memref<1x1x16x16xf32, #tpu.memory_space<vmem>>, vector<1x1x1x16xf32>
      %c0_199 = arith.constant 0 : index
      %c0_200 = arith.constant 0 : index
      %c8_201 = arith.constant 8 : index
      %c0_202 = arith.constant 0 : index
      %60 = vector.load %arg8[%c0_199, %c0_200, %c8_201, %c0_202] : memref<1x1x16x16xf32, #tpu.memory_space<vmem>>, vector<1x1x1x16xf32>
      tpu.vector_store %arg8[%c0_199, %c0_200, %c8_201, %c0_202], %59 {strides = array<i32>} : memref<1x1x16x16xf32, #tpu.memory_space<vmem>>, vector<1x1x1x16xf32>,
      %c0_203 = arith.constant 0 : index
      %c0_204 = arith.constant 0 : index
      %c6_205 = arith.constant 6 : index
      %c0_206 = arith.constant 0 : index
      %61 = vector.load %arg3[%c0_203, %c0_204, %c6_205, %c0_206] : memref<1x4x16x16xf32, #tpu.memory_space<vmem>>, vector<1x4x1x16xf32>
      %c0_207 = arith.constant 0 : index
      %c0_208 = arith.constant 0 : index
      %c9_209 = arith.constant 9 : index
      %c0_210 = arith.constant 0 : index
      %62 = vector.load %arg6[%c0_207, %c0_208, %c9_209, %c0_210] : memref<1x4x16x16xf32, #tpu.memory_space<vmem>>, vector<1x4x1x16xf32>
      tpu.vector_store %arg6[%c0_207, %c0_208, %c9_209, %c0_210], %61 {strides = array<i32>} : memref<1x4x16x16xf32, #tpu.memory_space<vmem>>, vector<1x4x1x16xf32>,
      %c0_211 = arith.constant 0 : index
      %c0_212 = arith.constant 0 : index
      %c6_213 = arith.constant 6 : index
      %c0_214 = arith.constant 0 : index
      %63 = vector.load %arg4[%c0_211, %c0_212, %c6_213, %c0_214] : memref<1x4x16x16xf32, #tpu.memory_space<vmem>>, vector<1x4x1x16xf32>
      %c0_215 = arith.constant 0 : index
      %c0_216 = arith.constant 0 : index
      %c9_217 = arith.constant 9 : index
      %c0_218 = arith.constant 0 : index
      %64 = vector.load %arg7[%c0_215, %c0_216, %c9_217, %c0_218] : memref<1x4x16x16xf32, #tpu.memory_space<vmem>>, vector<1x4x1x16xf32>
      tpu.vector_store %arg7[%c0_215, %c0_216, %c9_217, %c0_218], %63 {strides = array<i32>} : memref<1x4x16x16xf32, #tpu.memory_space<vmem>>, vector<1x4x1x16xf32>,
      %c0_219 = arith.constant 0 : index
      %c0_220 = arith.constant 0 : index
      %c6_221 = arith.constant 6 : index
      %c0_222 = arith.constant 0 : index
      %65 = vector.load %arg5[%c0_219, %c0_220, %c6_221, %c0_222] : memref<1x1x16x16xf32, #tpu.memory_space<vmem>>, vector<1x1x1x16xf32>
      %c0_223 = arith.constant 0 : index
      %c0_224 = arith.constant 0 : index
      %c9_225 = arith.constant 9 : index
      %c0_226 = arith.constant 0 : index
      %66 = vector.load %arg8[%c0_223, %c0_224, %c9_225, %c0_226] : memref<1x1x16x16xf32, #tpu.memory_space<vmem>>, vector<1x1x1x16xf32>
      tpu.vector_store %arg8[%c0_223, %c0_224, %c9_225, %c0_226], %65 {strides = array<i32>} : memref<1x1x16x16xf32, #tpu.memory_space<vmem>>, vector<1x1x1x16xf32>,
      %c0_227 = arith.constant 0 : index
      %c0_228 = arith.constant 0 : index
      %c5_229 = arith.constant 5 : index
      %c0_230 = arith.constant 0 : index
      %67 = vector.load %arg3[%c0_227, %c0_228, %c5_229, %c0_230] : memref<1x4x16x16xf32, #tpu.memory_space<vmem>>, vector<1x4x1x16xf32>
      %c0_231 = arith.constant 0 : index
      %c0_232 = arith.constant 0 : index
      %c10_233 = arith.constant 10 : index
      %c0_234 = arith.constant 0 : index
      %68 = vector.load %arg6[%c0_231, %c0_232, %c10_233, %c0_234] : memref<1x4x16x16xf32, #tpu.memory_space<vmem>>, vector<1x4x1x16xf32>
      tpu.vector_store %arg6[%c0_231, %c0_232, %c10_233, %c0_234], %67 {strides = array<i32>} : memref<1x4x16x16xf32, #tpu.memory_space<vmem>>, vector<1x4x1x16xf32>,
      %c0_235 = arith.constant 0 : index
      %c0_236 = arith.constant 0 : index
      %c5_237 = arith.constant 5 : index
      %c0_238 = arith.constant 0 : index
      %69 = vector.load %arg4[%c0_235, %c0_236, %c5_237, %c0_238] : memref<1x4x16x16xf32, #tpu.memory_space<vmem>>, vector<1x4x1x16xf32>
      %c0_239 = arith.constant 0 : index
      %c0_240 = arith.constant 0 : index
      %c10_241 = arith.constant 10 : index
      %c0_242 = arith.constant 0 : index
      %70 = vector.load %arg7[%c0_239, %c0_240, %c10_241, %c0_242] : memref<1x4x16x16xf32, #tpu.memory_space<vmem>>, vector<1x4x1x16xf32>
      tpu.vector_store %arg7[%c0_239, %c0_240, %c10_241, %c0_242], %69 {strides = array<i32>} : memref<1x4x16x16xf32, #tpu.memory_space<vmem>>, vector<1x4x1x16xf32>,
      %c0_243 = arith.constant 0 : index
      %c0_244 = arith.constant 0 : index
      %c5_245 = arith.constant 5 : index
      %c0_246 = arith.constant 0 : index
      %71 = vector.load %arg5[%c0_243, %c0_244, %c5_245, %c0_246] : memref<1x1x16x16xf32, #tpu.memory_space<vmem>>, vector<1x1x1x16xf32>
      %c0_247 = arith.constant 0 : index
      %c0_248 = arith.constant 0 : index
      %c10_249 = arith.constant 10 : index
      %c0_250 = arith.constant 0 : index
      %72 = vector.load %arg8[%c0_247, %c0_248, %c10_249, %c0_250] : memref<1x1x16x16xf32, #tpu.memory_space<vmem>>, vector<1x1x1x16xf32>
      tpu.vector_store %arg8[%c0_247, %c0_248, %c10_249, %c0_250], %71 {strides = array<i32>} : memref<1x1x16x16xf32, #tpu.memory_space<vmem>>, vector<1x1x1x16xf32>,
      %c0_251 = arith.constant 0 : index
      %c0_252 = arith.constant 0 : index
      %c4_253 = arith.constant 4 : index
      %c0_254 = arith.constant 0 : index
      %73 = vector.load %arg3[%c0_251, %c0_252, %c4_253, %c0_254] : memref<1x4x16x16xf32, #tpu.memory_space<vmem>>, vector<1x4x1x16xf32>
      %c0_255 = arith.constant 0 : index
      %c0_256 = arith.constant 0 : index
      %c11_257 = arith.constant 11 : index
      %c0_258 = arith.constant 0 : index
      %74 = vector.load %arg6[%c0_255, %c0_256, %c11_257, %c0_258] : memref<1x4x16x16xf32, #tpu.memory_space<vmem>>, vector<1x4x1x16xf32>
      tpu.vector_store %arg6[%c0_255, %c0_256, %c11_257, %c0_258], %73 {strides = array<i32>} : memref<1x4x16x16xf32, #tpu.memory_space<vmem>>, vector<1x4x1x16xf32>,
      %c0_259 = arith.constant 0 : index
      %c0_260 = arith.constant 0 : index
      %c4_261 = arith.constant 4 : index
      %c0_262 = arith.constant 0 : index
      %75 = vector.load %arg4[%c0_259, %c0_260, %c4_261, %c0_262] : memref<1x4x16x16xf32, #tpu.memory_space<vmem>>, vector<1x4x1x16xf32>
      %c0_263 = arith.constant 0 : index
      %c0_264 = arith.constant 0 : index
      %c11_265 = arith.constant 11 : index
      %c0_266 = arith.constant 0 : index
      %76 = vector.load %arg7[%c0_263, %c0_264, %c11_265, %c0_266] : memref<1x4x16x16xf32, #tpu.memory_space<vmem>>, vector<1x4x1x16xf32>
      tpu.vector_store %arg7[%c0_263, %c0_264, %c11_265, %c0_266], %75 {strides = array<i32>} : memref<1x4x16x16xf32, #tpu.memory_space<vmem>>, vector<1x4x1x16xf32>,
      %c0_267 = arith.constant 0 : index
      %c0_268 = arith.constant 0 : index
      %c4_269 = arith.constant 4 : index
      %c0_270 = arith.constant 0 : index
      %77 = vector.load %arg5[%c0_267, %c0_268, %c4_269, %c0_270] : memref<1x1x16x16xf32, #tpu.memory_space<vmem>>, vector<1x1x1x16xf32>
      %c0_271 = arith.constant 0 : index
      %c0_272 = arith.constant 0 : index
      %c11_273 = arith.constant 11 : index
      %c0_274 = arith.constant 0 : index
      %78 = vector.load %arg8[%c0_271, %c0_272, %c11_273, %c0_274] : memref<1x1x16x16xf32, #tpu.memory_space<vmem>>, vector<1x1x1x16xf32>
      tpu.vector_store %arg8[%c0_271, %c0_272, %c11_273, %c0_274], %77 {strides = array<i32>} : memref<1x1x16x16xf32, #tpu.memory_space<vmem>>, vector<1x1x1x16xf32>,
      %c0_275 = arith.constant 0 : index
      %c0_276 = arith.constant 0 : index
      %c3_277 = arith.constant 3 : index
      %c0_278 = arith.constant 0 : index
      %79 = vector.load %arg3[%c0_275, %c0_276, %c3_277, %c0_278] : memref<1x4x16x16xf32, #tpu.memory_space<vmem>>, vector<1x4x1x16xf32>
      %c0_279 = arith.constant 0 : index
      %c0_280 = arith.constant 0 : index
      %c12_281 = arith.constant 12 : index
      %c0_282 = arith.constant 0 : index
      %80 = vector.load %arg6[%c0_279, %c0_280, %c12_281, %c0_282] : memref<1x4x16x16xf32, #tpu.memory_space<vmem>>, vector<1x4x1x16xf32>
      tpu.vector_store %arg6[%c0_279, %c0_280, %c12_281, %c0_282], %79 {strides = array<i32>} : memref<1x4x16x16xf32, #tpu.memory_space<vmem>>, vector<1x4x1x16xf32>,
      %c0_283 = arith.constant 0 : index
      %c0_284 = arith.constant 0 : index
      %c3_285 = arith.constant 3 : index
      %c0_286 = arith.constant 0 : index
      %81 = vector.load %arg4[%c0_283, %c0_284, %c3_285, %c0_286] : memref<1x4x16x16xf32, #tpu.memory_space<vmem>>, vector<1x4x1x16xf32>
      %c0_287 = arith.constant 0 : index
      %c0_288 = arith.constant 0 : index
      %c12_289 = arith.constant 12 : index
      %c0_290 = arith.constant 0 : index
      %82 = vector.load %arg7[%c0_287, %c0_288, %c12_289, %c0_290] : memref<1x4x16x16xf32, #tpu.memory_space<vmem>>, vector<1x4x1x16xf32>
      tpu.vector_store %arg7[%c0_287, %c0_288, %c12_289, %c0_290], %81 {strides = array<i32>} : memref<1x4x16x16xf32, #tpu.memory_space<vmem>>, vector<1x4x1x16xf32>,
      %c0_291 = arith.constant 0 : index
      %c0_292 = arith.constant 0 : index
      %c3_293 = arith.constant 3 : index
      %c0_294 = arith.constant 0 : index
      %83 = vector.load %arg5[%c0_291, %c0_292, %c3_293, %c0_294] : memref<1x1x16x16xf32, #tpu.memory_space<vmem>>, vector<1x1x1x16xf32>
      %c0_295 = arith.constant 0 : index
      %c0_296 = arith.constant 0 : index
      %c12_297 = arith.constant 12 : index
      %c0_298 = arith.constant 0 : index
      %84 = vector.load %arg8[%c0_295, %c0_296, %c12_297, %c0_298] : memref<1x1x16x16xf32, #tpu.memory_space<vmem>>, vector<1x1x1x16xf32>
      tpu.vector_store %arg8[%c0_295, %c0_296, %c12_297, %c0_298], %83 {strides = array<i32>} : memref<1x1x16x16xf32, #tpu.memory_space<vmem>>, vector<1x1x1x16xf32>,
      %c0_299 = arith.constant 0 : index
      %c0_300 = arith.constant 0 : index
      %c2_301 = arith.constant 2 : index
      %c0_302 = arith.constant 0 : index
      %85 = vector.load %arg3[%c0_299, %c0_300, %c2_301, %c0_302] : memref<1x4x16x16xf32, #tpu.memory_space<vmem>>, vector<1x4x1x16xf32>
      %c0_303 = arith.constant 0 : index
      %c0_304 = arith.constant 0 : index
      %c13_305 = arith.constant 13 : index
      %c0_306 = arith.constant 0 : index
      %86 = vector.load %arg6[%c0_303, %c0_304, %c13_305, %c0_306] : memref<1x4x16x16xf32, #tpu.memory_space<vmem>>, vector<1x4x1x16xf32>
      tpu.vector_store %arg6[%c0_303, %c0_304, %c13_305, %c0_306], %85 {strides = array<i32>} : memref<1x4x16x16xf32, #tpu.memory_space<vmem>>, vector<1x4x1x16xf32>,
      %c0_307 = arith.constant 0 : index
      %c0_308 = arith.constant 0 : index
      %c2_309 = arith.constant 2 : index
      %c0_310 = arith.constant 0 : index
      %87 = vector.load %arg4[%c0_307, %c0_308, %c2_309, %c0_310] : memref<1x4x16x16xf32, #tpu.memory_space<vmem>>, vector<1x4x1x16xf32>
      %c0_311 = arith.constant 0 : index
      %c0_312 = arith.constant 0 : index
      %c13_313 = arith.constant 13 : index
      %c0_314 = arith.constant 0 : index
      %88 = vector.load %arg7[%c0_311, %c0_312, %c13_313, %c0_314] : memref<1x4x16x16xf32, #tpu.memory_space<vmem>>, vector<1x4x1x16xf32>
      tpu.vector_store %arg7[%c0_311, %c0_312, %c13_313, %c0_314], %87 {strides = array<i32>} : memref<1x4x16x16xf32, #tpu.memory_space<vmem>>, vector<1x4x1x16xf32>,
      %c0_315 = arith.constant 0 : index
      %c0_316 = arith.constant 0 : index
      %c2_317 = arith.constant 2 : index
      %c0_318 = arith.constant 0 : index
      %89 = vector.load %arg5[%c0_315, %c0_316, %c2_317, %c0_318] : memref<1x1x16x16xf32, #tpu.memory_space<vmem>>, vector<1x1x1x16xf32>
      %c0_319 = arith.constant 0 : index
      %c0_320 = arith.constant 0 : index
      %c13_321 = arith.constant 13 : index
      %c0_322 = arith.constant 0 : index
      %90 = vector.load %arg8[%c0_319, %c0_320, %c13_321, %c0_322] : memref<1x1x16x16xf32, #tpu.memory_space<vmem>>, vector<1x1x1x16xf32>
      tpu.vector_store %arg8[%c0_319, %c0_320, %c13_321, %c0_322], %89 {strides = array<i32>} : memref<1x1x16x16xf32, #tpu.memory_space<vmem>>, vector<1x1x1x16xf32>,
      %c0_323 = arith.constant 0 : index
      %c0_324 = arith.constant 0 : index
      %c1_325 = arith.constant 1 : index
      %c0_326 = arith.constant 0 : index
      %91 = vector.load %arg3[%c0_323, %c0_324, %c1_325, %c0_326] : memref<1x4x16x16xf32, #tpu.memory_space<vmem>>, vector<1x4x1x16xf32>
      %c0_327 = arith.constant 0 : index
      %c0_328 = arith.constant 0 : index
      %c14_329 = arith.constant 14 : index
      %c0_330 = arith.constant 0 : index
      %92 = vector.load %arg6[%c0_327, %c0_328, %c14_329, %c0_330] : memref<1x4x16x16xf32, #tpu.memory_space<vmem>>, vector<1x4x1x16xf32>
      tpu.vector_store %arg6[%c0_327, %c0_328, %c14_329, %c0_330], %91 {strides = array<i32>} : memref<1x4x16x16xf32, #tpu.memory_space<vmem>>, vector<1x4x1x16xf32>,
      %c0_331 = arith.constant 0 : index
      %c0_332 = arith.constant 0 : index
      %c1_333 = arith.constant 1 : index
      %c0_334 = arith.constant 0 : index
      %93 = vector.load %arg4[%c0_331, %c0_332, %c1_333, %c0_334] : memref<1x4x16x16xf32, #tpu.memory_space<vmem>>, vector<1x4x1x16xf32>
      %c0_335 = arith.constant 0 : index
      %c0_336 = arith.constant 0 : index
      %c14_337 = arith.constant 14 : index
      %c0_338 = arith.constant 0 : index
      %94 = vector.load %arg7[%c0_335, %c0_336, %c14_337, %c0_338] : memref<1x4x16x16xf32, #tpu.memory_space<vmem>>, vector<1x4x1x16xf32>
      tpu.vector_store %arg7[%c0_335, %c0_336, %c14_337, %c0_338], %93 {strides = array<i32>} : memref<1x4x16x16xf32, #tpu.memory_space<vmem>>, vector<1x4x1x16xf32>,
      %c0_339 = arith.constant 0 : index
      %c0_340 = arith.constant 0 : index
      %c1_341 = arith.constant 1 : index
      %c0_342 = arith.constant 0 : index
      %95 = vector.load %arg5[%c0_339, %c0_340, %c1_341, %c0_342] : memref<1x1x16x16xf32, #tpu.memory_space<vmem>>, vector<1x1x1x16xf32>
      %c0_343 = arith.constant 0 : index
      %c0_344 = arith.constant 0 : index
      %c14_345 = arith.constant 14 : index
      %c0_346 = arith.constant 0 : index
      %96 = vector.load %arg8[%c0_343, %c0_344, %c14_345, %c0_346] : memref<1x1x16x16xf32, #tpu.memory_space<vmem>>, vector<1x1x1x16xf32>
      tpu.vector_store %arg8[%c0_343, %c0_344, %c14_345, %c0_346], %95 {strides = array<i32>} : memref<1x1x16x16xf32, #tpu.memory_space<vmem>>, vector<1x1x1x16xf32>,
      %c0_347 = arith.constant 0 : index
      %c0_348 = arith.constant 0 : index
      %c0_349 = arith.constant 0 : index
      %c0_350 = arith.constant 0 : index
      %97 = vector.load %arg3[%c0_347, %c0_348, %c0_349, %c0_350] : memref<1x4x16x16xf32, #tpu.memory_space<vmem>>, vector<1x4x1x16xf32>
      %c0_351 = arith.constant 0 : index
      %c0_352 = arith.constant 0 : index
      %c15_353 = arith.constant 15 : index
      %c0_354 = arith.constant 0 : index
      %98 = vector.load %arg6[%c0_351, %c0_352, %c15_353, %c0_354] : memref<1x4x16x16xf32, #tpu.memory_space<vmem>>, vector<1x4x1x16xf32>
      tpu.vector_store %arg6[%c0_351, %c0_352, %c15_353, %c0_354], %97 {strides = array<i32>} : memref<1x4x16x16xf32, #tpu.memory_space<vmem>>, vector<1x4x1x16xf32>,
      %c0_355 = arith.constant 0 : index
      %c0_356 = arith.constant 0 : index
      %c0_357 = arith.constant 0 : index
      %c0_358 = arith.constant 0 : index
      %99 = vector.load %arg4[%c0_355, %c0_356, %c0_357, %c0_358] : memref<1x4x16x16xf32, #tpu.memory_space<vmem>>, vector<1x4x1x16xf32>
      %c0_359 = arith.constant 0 : index
      %c0_360 = arith.constant 0 : index
      %c15_361 = arith.constant 15 : index
      %c0_362 = arith.constant 0 : index
      %100 = vector.load %arg7[%c0_359, %c0_360, %c15_361, %c0_362] : memref<1x4x16x16xf32, #tpu.memory_space<vmem>>, vector<1x4x1x16xf32>
      tpu.vector_store %arg7[%c0_359, %c0_360, %c15_361, %c0_362], %99 {strides = array<i32>} : memref<1x4x16x16xf32, #tpu.memory_space<vmem>>, vector<1x4x1x16xf32>,
      %c0_363 = arith.constant 0 : index
      %c0_364 = arith.constant 0 : index
      %c0_365 = arith.constant 0 : index
      %c0_366 = arith.constant 0 : index
      %101 = vector.load %arg5[%c0_363, %c0_364, %c0_365, %c0_366] : memref<1x1x16x16xf32, #tpu.memory_space<vmem>>, vector<1x1x1x16xf32>
      %c0_367 = arith.constant 0 : index
      %c0_368 = arith.constant 0 : index
      %c15_369 = arith.constant 15 : index
      %c0_370 = arith.constant 0 : index
      %102 = vector.load %arg8[%c0_367, %c0_368, %c15_369, %c0_370] : memref<1x1x16x16xf32, #tpu.memory_space<vmem>>, vector<1x1x1x16xf32>
      tpu.vector_store %arg8[%c0_367, %c0_368, %c15_369, %c0_370], %101 {strides = array<i32>} : memref<1x1x16x16xf32, #tpu.memory_space<vmem>>, vector<1x1x1x16xf32>,
    } else {
    }
    %true = arith.constant true
    %4 = arith.xori %1, %true : i1
    %5 = arith.extui %4 : i1 to i32
    %c0_i32_1 = arith.constant 0 : i32
    %6 = arith.cmpi ne, %5, %c0_i32_1 : i32
    scf.if %6 {
      %c0_2 = arith.constant 0 : index
      %c0_3 = arith.constant 0 : index
      %c0_4 = arith.constant 0 : index
      %c0_5 = arith.constant 0 : index
      %7 = vector.load %arg3[%c0_2, %c0_3, %c0_4, %c0_5] : memref<1x4x16x16xf32, #tpu.memory_space<vmem>>, vector<1x4x16x16xf32>
      %c0_6 = arith.constant 0 : index
      %c0_7 = arith.constant 0 : index
      %c0_8 = arith.constant 0 : index
      %c0_9 = arith.constant 0 : index
      %8 = vector.load %arg6[%c0_6, %c0_7, %c0_8, %c0_9] : memref<1x4x16x16xf32, #tpu.memory_space<vmem>>, vector<1x4x16x16xf32>
      tpu.vector_store %arg6[%c0_6, %c0_7, %c0_8, %c0_9], %7 {strides = array<i32>} : memref<1x4x16x16xf32, #tpu.memory_space<vmem>>, vector<1x4x16x16xf32>,
      %c0_10 = arith.constant 0 : index
      %c0_11 = arith.constant 0 : index
      %c0_12 = arith.constant 0 : index
      %c0_13 = arith.constant 0 : index
      %9 = vector.load %arg4[%c0_10, %c0_11, %c0_12, %c0_13] : memref<1x4x16x16xf32, #tpu.memory_space<vmem>>, vector<1x4x16x16xf32>
      %c0_14 = arith.constant 0 : index
      %c0_15 = arith.constant 0 : index
      %c0_16 = arith.constant 0 : index
      %c0_17 = arith.constant 0 : index
      %10 = vector.load %arg7[%c0_14, %c0_15, %c0_16, %c0_17] : memref<1x4x16x16xf32, #tpu.memory_space<vmem>>, vector<1x4x16x16xf32>
      tpu.vector_store %arg7[%c0_14, %c0_15, %c0_16, %c0_17], %9 {strides = array<i32>} : memref<1x4x16x16xf32, #tpu.memory_space<vmem>>, vector<1x4x16x16xf32>,
      %c0_18 = arith.constant 0 : index
      %c0_19 = arith.constant 0 : index
      %c0_20 = arith.constant 0 : index
      %c0_21 = arith.constant 0 : index
      %11 = vector.load %arg5[%c0_18, %c0_19, %c0_20, %c0_21] : memref<1x1x16x16xf32, #tpu.memory_space<vmem>>, vector<1x1x16x16xf32>
      %c0_22 = arith.constant 0 : index
      %c0_23 = arith.constant 0 : index
      %c0_24 = arith.constant 0 : index
      %c0_25 = arith.constant 0 : index
      %12 = vector.load %arg8[%c0_22, %c0_23, %c0_24, %c0_25] : memref<1x1x16x16xf32, #tpu.memory_space<vmem>>, vector<1x1x16x16xf32>
      tpu.vector_store %arg8[%c0_22, %c0_23, %c0_24, %c0_25], %11 {strides = array<i32>} : memref<1x1x16x16xf32, #tpu.memory_space<vmem>>, vector<1x1x16x16xf32>,
    } else {
    }
    return
  }
  func.func @transform_0(%arg0: i32, %arg1: i32, %arg2: memref<1xi32, #tpu.memory_space<smem>>) -> (i32, i32, i32, i32) {
    %c0 = arith.constant 0 : index
    %0 = memref.load %arg2[%c0] : memref<1xi32, #tpu.memory_space<smem>>
    %c0_i32 = arith.constant 0 : i32
    %1 = arith.cmpi sgt, %0, %c0_i32 : i32
    %c0_i32_0 = arith.constant 0 : i32
    %2 = arith.subi %c0_i32_0, %arg1 : i32
    %3 = arith.select %1, %2, %arg1 : i32
    %c0_i32_1 = arith.constant 0 : i32
    %c0_i32_2 = arith.constant 0 : i32
    %c0_i32_3 = arith.constant 0 : i32
    return %arg0, %c0_i32_1, %3, %c0_i32_2 : i32, i32, i32, i32
  }
  func.func @transform_1(%arg0: i32, %arg1: i32, %arg2: memref<1xi32, #tpu.memory_space<smem>>) -> (i32, i32, i32, i32) {
    %c0 = arith.constant 0 : index
    %0 = memref.load %arg2[%c0] : memref<1xi32, #tpu.memory_space<smem>>
    %c0_i32 = arith.constant 0 : i32
    %1 = arith.cmpi sgt, %0, %c0_i32 : i32
    %c0_i32_0 = arith.constant 0 : i32
    %2 = arith.subi %c0_i32_0, %arg1 : i32
    %3 = arith.select %1, %2, %arg1 : i32
    %c0_i32_1 = arith.constant 0 : i32
    %c0_i32_2 = arith.constant 0 : i32
    %c0_i32_3 = arith.constant 0 : i32
    return %arg0, %c0_i32_1, %3, %c0_i32_2 : i32, i32, i32, i32
  }
  func.func @transform_2(%arg0: i32, %arg1: i32, %arg2: memref<1xi32, #tpu.memory_space<smem>>) -> (i32, i32, i32, i32) {
    %c0 = arith.constant 0 : index
    %0 = memref.load %arg2[%c0] : memref<1xi32, #tpu.memory_space<smem>>
    %c0_i32 = arith.constant 0 : i32
    %1 = arith.cmpi sgt, %0, %c0_i32 : i32
    %c0_i32_0 = arith.constant 0 : i32
    %2 = arith.subi %c0_i32_0, %arg1 : i32
    %3 = arith.select %1, %2, %arg1 : i32
    %c0_i32_1 = arith.constant 0 : i32
    %c0_i32_2 = arith.constant 0 : i32
    %c0_i32_3 = arith.constant 0 : i32
    return %arg0, %c0_i32_1, %3, %c0_i32_2 : i32, i32, i32, i32
  }
  func.func @transform_3(%arg0: i32, %arg1: i32, %arg2: memref<1xi32, #tpu.memory_space<smem>>) -> (i32, i32, i32, i32) {
    %c0_i32 = arith.constant 0 : i32
    %c0_i32_0 = arith.constant 0 : i32
    %c0_i32_1 = arith.constant 0 : i32
    return %arg0, %c0_i32, %arg1, %c0_i32_0 : i32, i32, i32, i32
  }
  func.func @transform_4(%arg0: i32, %arg1: i32, %arg2: memref<1xi32, #tpu.memory_space<smem>>) -> (i32, i32, i32, i32) {
    %c0_i32 = arith.constant 0 : i32
    %c0_i32_0 = arith.constant 0 : i32
    %c0_i32_1 = arith.constant 0 : i32
    return %arg0, %c0_i32, %arg1, %c0_i32_0 : i32, i32, i32, i32
  }
  func.func @transform_5(%arg0: i32, %arg1: i32, %arg2: memref<1xi32, #tpu.memory_space<smem>>) -> (i32, i32, i32, i32) {
    %c0_i32 = arith.constant 0 : i32
    %c0_i32_0 = arith.constant 0 : i32
    %c0_i32_1 = arith.constant 0 : i32
    return %arg0, %c0_i32, %arg1, %c0_i32_0 : i32, i32, i32, i32
  }
}

</mosaic_0001>

<bundles_post_ra>
// kernel: tpu_custom_call.1
= control target key start
LH: loop header
LB: loop body
LE: loop exit
PB: predicated region body
PF: predicated region fallthrough
CT: control target
= control target key end

     0   :  { %s2213_s0 = inlined_call_operand.<no memory space> [shape: s32[1], index: 0, kind: input, shape index: {}]   ;;  %s2214_s1 = inlined_call_operand.hbm [shape: f32[2,4,16,16], index: 1, kind: input, shape index: {}]   ;;  %s2215_s2 = inlined_call_operand.hbm [shape: f32[2,4,16,16], index: 2, kind: input, shape index: {}]   ;;  %s2216_s3 = inlined_call_operand.hbm [shape: f32[2,1,16,16], index: 3, kind: input, shape index: {}]   ;;  %s2217_s4 = inlined_call_operand.hbm [shape: f32[2,4,16,16], index: 4, kind: output, shape index: {0}]   ;;  %s2218_s5 = inlined_call_operand.hbm [shape: f32[2,4,16,16], index: 5, kind: output, shape index: {1}]   ;;  %s2219_s6 = inlined_call_operand.hbm [shape: f32[2,1,16,16], index: 6, kind: output, shape index: {2}]  }
   0x1   :  { %2226 = sst [smem:[#allocation22_spill]] %s2214_s1 }
   0x2   :  { %2227 = sst [smem:[#allocation23_spill]] %s2215_s2 }
   0x3   :  { %12 = sst [smem:[#allocation3]] %s2213_s0 }
   0x4   :  { %13 = vsyncpa [#allocation5], 0 }
   0x5   :  { %15 = vsyncpa [#allocation5 + $0x1], 0 }
   0x6   :  { %16 = vsyncpa [#allocation8], 0 }
   0x7   :  { %18 = vsyncpa [#allocation8 + $0x1], 0 }
   0x8   :  { %19 = vsyncpa [#allocation6], 0 }
   0x9   :  { %21 = vsyncpa [#allocation6 + $0x1], 0 }
   0xa   :  { %22 = vsyncpa [#allocation12], 0 }
   0xb   :  { %24 = vsyncpa [#allocation12 + $0x1], 0  ;;  %s1423_s23 = smov 0   ;;  %s1425_s24 = smov 0  }
   0xc   :  { %s1427_s25 = smov 0   ;;  %s1429_s26 = smov 0  }
   0xd   :  { %s1431_s27 = smov 0   ;;  %s1433_s28 = smov 0  }
   0xe LB: > { %2228 = sst [smem:[#allocation18_spill]] %s1361_s25  ;;  %s1454_s0 = sadd.s32 4294967295, %s1373_s28   ;;  %s1373_s28 = sphi %s1433_s28, %s30_s28   ;;  %s1369_s27 = sphi %s1431_s27, %s2250_s27   ;;  %s1365_s26 = sphi %s1429_s26, %s2249_s26   ;;  %s1361_s25 = sphi %s1427_s25, %s2245_s25   ;;  %s1357_s24 = sphi %s1425_s24, %s2248_s24   ;;  %s1353_s23 = sphi %s1423_s23, %s2247_s23  }
   0xf   : > { %s2220_s29 = sadd.s32 4294967294, %s1373_s28   ;;  %s42_s30 = sadd.s32 1, %s1369_s27 }
  0x10   : > { %s59_s7 = sadd.s32 1, %s1361_s25  ;;  %p44_p0 = scmp.ge.s32.totalorder %s42_s30, 2 }
  0x11   : > { %p66_p1 = scmp.ne.s32.totalorder %s1361_s25, %s1357_s24  ;;  %p67_p2 = scmp.eq.s32.totalorder %s1373_s28, 0 }
  0x12   : > { %p72_p3 = scmp.ne.s32.totalorder %s1357_s24, %s1353_s23  ;;  %s2252_s30 = smov (%p44_p0, %s42_s30), 0 }
  0x13   : > { %2229 = sst [smem:[#allocation19_spill]] %s2252_s30  ;;  %p1466_p4 = por %p67_p2, %p66_p1 }
  0x14   : > { %p73_p5 = scmp.eq.s32.totalorder %s1454_s0, 0  ;;  %s54_s9 = ssub.s32 %s1369_s27, %s2252_s30 }
  0x15   : > { %p170_p6 = scmp.eq.s32.totalorder %s1454_s0, 1  ;;  %p57_p7 = scmp.eq.s32.totalorder %s54_s9, 0 }
  0x16   : > { %p1474_p8 = por %p73_p5, %p72_p3  ;;  %p176_p10 = scmp.eq.s32.totalorder %s2220_s29, 1 }
  0x17   : > { %p1478_p9 = por %p170_p6, %p66_p1  ;;  %p1095_p13 = scmp.lt.s32.totalorder %s1373_s28, 2 }
  0x18   : > { %s1485_s12 = scalar_select %p57_p7, %s1361_s25, %s59_s7  }
  0x19   : > { %p1487_p11 = por %p176_p10, %p72_p3  ;;  %s1494_s14 = sand.u32 1, %s1361_s25  }
  0x1a   : > { %2233 = sst [smem:[#allocation20_spill]] %s1485_s12  ;;  %s1028_s15 = sshll.u32 %s1494_s14, 6 }
  0x1b   : > { %s2234_s13 = scalar_select %p1487_p11, 1, 0 }
  0x1c   : > { %s1057_s16 = sshll.u32 %s1369_s27, 10  ;;  %p1500_p0 = pnand %p1095_p13, %p1466_p4 }
  0x1d   : > { %2235 = sst [smem:[#allocation21_spill]] %s2234_s13  ;;  %s279_s18 = sand.u32 1, %s1373_s28  }
  0x1e   : > { %s2237_s2 = sld [smem:[#allocation23_spill]]  ;;  %s283_s22 = scalar_lea.vmem [#allocation7], %s1028_s15 }
  0x1f   : > { %s296_s7 = sshll.u32 %s283_s22, 4  ;;  %p1037_p1 = scmp.ge.s32.totalorder %s1373_s28, 1  ;;  %s297_s7 = int_to_ptr.vmem [resolvable:$true] %s296_s7 }
  0x20   : > { %p331_p2 = scmp.lt.s32.totalorder %s1373_s28, 3  ;;  %s1514_s9 = scalar_lea.sflag [#allocation8], %s279_s18 }
  0x21   : > { %p1151_p3 = pneg %p1500_p0  ;;  %s1162_s8 = scalar_lea.vmem %s297_s7, 1024 }
  0x22   : > { %p1163_p4 = scmp.ne.s32.totalorder %s297_s7, %s1162_s8  ;;  %s1375_s29 = smov [#allocation7]  }
  0x23   : > { %s1167_s30 = sshll.u32 %s1375_s29, 4  ;;  %s1168_s30 = int_to_ptr.vmem [resolvable:$false] %s1167_s30 }
  0x24   : > { %s295_s21 = scalar_lea.hbm %s2237_s2, %s1057_s16  ;;  %p1165_p5 = pnand %p1163_p4, %p1151_p3 }
  0x25   : > { %s1169_s19 = scalar_lea.vmem %s1168_s30, 2048  ;;  %p1170_p7 = scmp.lt.s32.totalorder %s297_s7, %s1168_s30 }
  0x26   : > { %p1166_p6 = pneg %p1165_p5  ;;  %p1171_p10 = scmp.lt.s32.totalorder %s1169_s19, %s1162_s8 }
  0x28   : > { %p1172_p13 = por %p1171_p10, %p1170_p7 }
  0x2a   : > { %p1173_p12 = pnand %p1172_p13, %p1166_p6 }
  0x2c   : > { %1176 = shalt.err (!%p1173_p12)
}
  0x2d   : > { %s2224_s20 = smov 128   ;;  %s1377_s18 = smov 8  }
  0x2e   : > { %1081 = dma.hbm_to_vmem [thread:$0]  (!%p1500_p0), %s295_s21, 1024, %s297_s7, %s1514_s9, %s2224_s20, %s2224_s20, %s1377_s18  }
  0x2f   : > { %p1531_p4 = pnand %p1037_p1, %p331_p2  ;;  %s2239_s1 = sld [smem:[#allocation22_spill]] }
  0x30   : > { %s256_s19 = scalar_lea.vmem [#allocation4], %s1028_s15  ;;  %s1034_s12 = sshll.u32 %s1494_s14, 4 }
  0x31   : > { %s269_s2 = sshll.u32 %s256_s19, 4  ;;  %s253_s25 = scalar_lea.sflag [#allocation5], %s1494_s14  ;;  %s270_s2 = int_to_ptr.vmem [resolvable:$true] %s269_s2 }
  0x32   : > { %s1190_s13 = scalar_lea.vmem %s270_s2, 1024  ;;  %s1378_s21 = smov [#allocation4]  }
  0x33   : > { %p1191_p12 = scmp.ne.s32.totalorder %s270_s2, %s1190_s13  ;;  %s1195_s7 = sshll.u32 %s1378_s21, 4  ;;  %s1196_s7 = int_to_ptr.vmem [resolvable:$false] %s1195_s7 }
  0x34   : > { %s1197_s20 = scalar_lea.vmem %s1196_s7, 2048  ;;  %p1198_p2 = scmp.lt.s32.totalorder %s270_s2, %s1196_s7 }
  0x35   : > { %s268_s8 = scalar_lea.hbm %s2239_s1, %s1057_s16  ;;  %p1193_p5 = pnand %p1191_p12, %p1151_p3 }
  0x36   : > { %p1199_p6 = scmp.lt.s32.totalorder %s1197_s20, %s1190_s13 }
  0x37   : > { %p1194_p1 = pneg %p1193_p5 }
  0x38   : > { %p1200_p7 = por %p1199_p6, %p1198_p2 }
  0x3a   : > { %p1201_p10 = pnand %p1200_p7, %p1194_p1 }
  0x3c   : > { %1204 = shalt.err (!%p1201_p10)
}
  0x3d   : > { %s2240_s15 = smov 128   ;;  %s1059_s14 = sshll.u32 %s1369_s27, 8 }
  0x3e   : > { %1078 = dma.hbm_to_vmem [thread:$0]  (!%p1500_p0), %s268_s8, 1024, %s270_s2, %s253_s25, %s2240_s15, %s2240_s15, %s1377_s18  }
  0x3f   : > { %s310_s16 = scalar_lea.vmem [#allocation9], %s1034_s12  ;;  %s322_s21 = scalar_lea.hbm %s2216_s3, %s1059_s14 }
  0x40   : > { %s323_s30 = sshll.u32 %s310_s16, 4  ;;  %s1379_s20 = smov [#allocation9]   ;;  %s324_s30 = int_to_ptr.vmem [resolvable:$true] %s323_s30 }
  0x41   : > { %s1218_s13 = scalar_lea.vmem %s324_s30, 256  ;;  %s1223_s7 = sshll.u32 %s1379_s20, 4  ;;  %s1224_s7 = int_to_ptr.vmem [resolvable:$false] %s1223_s7 }
  0x42   : > { %p1219_p13 = scmp.ne.s32.totalorder %s324_s30, %s1218_s13  ;;  %s1225_s1 = scalar_lea.vmem %s1224_s7, 512 }
  0x43   : > { %p1226_p1 = scmp.lt.s32.totalorder %s324_s30, %s1224_s7  ;;  %p1227_p2 = scmp.lt.s32.totalorder %s1225_s1, %s1218_s13 }
  0x44   : > { %p1221_p12 = pnand %p1219_p13, %p1151_p3 }
  0x45   : > { %p1228_p6 = por %p1227_p2, %p1226_p1 }
  0x46   : > { %p1222_p5 = pneg %p1221_p12 }
  0x48   : > { %p1229_p7 = pnand %p1228_p6, %p1222_p5 }
  0x4a   : > { %1232 = shalt.err (!%p1229_p7)
}
  0x4b   : > { %1084 = dma.hbm_to_vmem [thread:$0]  (!%p1500_p0), %s322_s21, 256, %s324_s30, %s1514_s9, %s2240_s15, %s2240_s15, %s1377_s18  }
  0x4c   : > { %335 = sbr.rel (%p1531_p4) target bundleno = 281 (0x119), region = 32  ;;  %s1568_s2 = sand.u32 (!%p1531_p4), 1, %s1357_s24  }
  0x4d   : > { %s1038_s1 = sshll.u32 (!%p1531_p4), %s1568_s2, 6  ;;  %s338_s25 = scalar_lea.sflag (!%p1531_p4), [#allocation5], %s1568_s2 }
  0x4e   : > { %s1572_s12 = scalar_lea.vmem (!%p1531_p4), [#allocation4], %s1038_s1 }
  0x51   : > { %1336 = dma.done.wait (%p1474_p8), %s338_s25, 1024  }
  0x52   : > { %1338 = vsyncadd (%p1474_p8), %s338_s25, 4294966272  ;;  %s346_s17 = sand.u32 1, %s1454_s0   ;;  %s1581_s18 = scalar_lea.vmem [#allocation7], %s1038_s1 }
  0x53   : > { %s347_s9 = scalar_lea.sflag [#allocation8], %s346_s17 }
  0x54   : > { %1340 = dma.done.wait (%p1474_p8), %s347_s9, 1280  }
  0x55   : > { %1342 = vsyncadd (%p1474_p8), %s347_s9, 4294966016  ;;  %s1040_s29 = sshll.u32 %s1568_s2, 4  ;;  %s1588_s8 = sld [smem:[#allocation3]] }
  0x56   : > { %s1590_s15 = scalar_lea.vmem [#allocation9], %s1040_s29  ;;  %s1592_s14 = scalar_lea.vmem [#allocation10], %s1038_s1 }
  0x57   : > { %s1594_s16 = scalar_lea.vmem [#allocation11], %s1038_s1  ;;  %s1596_s30 = scalar_lea.vmem [#allocation13], %s1040_s29 }
  0x5b   : > { %p1044_p0 = scmp.le.s32.totalorder %s1588_s8, 0 }
  0x5d   : > { %428 = sbr.rel (%p1044_p0) target bundleno = 195 (0xc3), region = 48 }
  0x62   : > { %v429_v0 = vld [vmem:[%s1572_s12 + $0xf] sm:$0x1]  ;;  %vm433_vm0 = vcmask 122880   ;;  %v430_v1 = vld [vmem:[%s1572_s12 + $0x1f] sm:$0x1] }
  0x63   : > { %434 = vst.msk [vmem:[%s1592_s14] sm:$0x1] %vm433_vm0, %v429_v0  ;;  %435 = vst.msk [vmem:[%s1592_s14 + $0x10] sm:$0x1] %vm433_vm0, %v430_v1  ;;  %v431_v2 = vld [vmem:[%s1572_s12 + $0x2f] sm:$0x1] }
  0x64   : > { %v432_v3 = vld [vmem:[%s1572_s12 + $0x3f] sm:$0x1]  ;;  %v438_v4 = vld [vmem:[%s1581_s18 + $0xf] sm:$0x1]  ;;  %436 = vst.msk [vmem:[%s1592_s14 + $0x20] sm:$0x1] %vm433_vm0, %v431_v2 }
  0x65   : > { %437 = vst.msk [vmem:[%s1592_s14 + $0x30] sm:$0x1] %vm433_vm0, %v432_v3  ;;  %442 = vst.msk [vmem:[%s1594_s16] sm:$0x1] %vm433_vm0, %v438_v4  ;;  %v439_v5 = vld [vmem:[%s1581_s18 + $0x1f] sm:$0x1] }
  0x66   : > { %v440_v6 = vld [vmem:[%s1581_s18 + $0x2f] sm:$0x1]  ;;  %v441_v7 = vld [vmem:[%s1581_s18 + $0x3f] sm:$0x1]  ;;  %443 = vst.msk [vmem:[%s1594_s16 + $0x10] sm:$0x1] %vm433_vm0, %v439_v5 }
  0x67   : > { %444 = vst.msk [vmem:[%s1594_s16 + $0x20] sm:$0x1] %vm433_vm0, %v440_v6  ;;  %445 = vst.msk [vmem:[%s1594_s16 + $0x30] sm:$0x1] %vm433_vm0, %v441_v7  ;;  %v446_v8 = vld [vmem:[%s1590_s15 + $0xf] sm:$0x1] }
  0x68   : > { %v448_v9 = vld [vmem:[%s1572_s12 + $0xe] sm:$0x1]  ;;  %v449_v10 = vld [vmem:[%s1572_s12 + $0x1e] sm:$0x1]  ;;  %447 = vst.msk [vmem:[%s1596_s30] sm:$0x1] %vm433_vm0, %v446_v8 }
  0x69   : > { %452 = vst.msk [vmem:[%s1592_s14 + $0x1] sm:$0x1] %vm433_vm0, %v448_v9  ;;  %453 = vst.msk [vmem:[%s1592_s14 + $0x11] sm:$0x1] %vm433_vm0, %v449_v10  ;;  %v450_v11 = vld [vmem:[%s1572_s12 + $0x2e] sm:$0x1] }
  0x6a   : > { %v451_v12 = vld [vmem:[%s1572_s12 + $0x3e] sm:$0x1]  ;;  %v456_v13 = vld [vmem:[%s1581_s18 + $0xe] sm:$0x1]  ;;  %454 = vst.msk [vmem:[%s1592_s14 + $0x21] sm:$0x1] %vm433_vm0, %v450_v11 }
  0x6b   : > { %455 = vst.msk [vmem:[%s1592_s14 + $0x31] sm:$0x1] %vm433_vm0, %v451_v12  ;;  %460 = vst.msk [vmem:[%s1594_s16 + $0x1] sm:$0x1] %vm433_vm0, %v456_v13  ;;  %v457_v14 = vld [vmem:[%s1581_s18 + $0x1e] sm:$0x1] }
  0x6c   : > { %v458_v15 = vld [vmem:[%s1581_s18 + $0x2e] sm:$0x1]  ;;  %v459_v16 = vld [vmem:[%s1581_s18 + $0x3e] sm:$0x1]  ;;  %461 = vst.msk [vmem:[%s1594_s16 + $0x11] sm:$0x1] %vm433_vm0, %v457_v14 }
  0x6d   : > { %462 = vst.msk [vmem:[%s1594_s16 + $0x21] sm:$0x1] %vm433_vm0, %v458_v15  ;;  %463 = vst.msk [vmem:[%s1594_s16 + $0x31] sm:$0x1] %vm433_vm0, %v459_v16  ;;  %v464_v17 = vld [vmem:[%s1590_s15 + $0xe] sm:$0x1] }
  0x6e   : > { %v466_v18 = vld [vmem:[%s1572_s12 + $0xd] sm:$0x1]  ;;  %v467_v19 = vld [vmem:[%s1572_s12 + $0x1d] sm:$0x1]  ;;  %465 = vst.msk [vmem:[%s1596_s30 + $0x1] sm:$0x1] %vm433_vm0, %v464_v17 }
  0x6f   : > { %470 = vst.msk [vmem:[%s1592_s14 + $0x2] sm:$0x1] %vm433_vm0, %v466_v18  ;;  %471 = vst.msk [vmem:[%s1592_s14 + $0x12] sm:$0x1] %vm433_vm0, %v467_v19  ;;  %v468_v20 = vld [vmem:[%s1572_s12 + $0x2d] sm:$0x1] }
  0x70   : > { %v469_v21 = vld [vmem:[%s1572_s12 + $0x3d] sm:$0x1]  ;;  %v474_v22 = vld [vmem:[%s1581_s18 + $0xd] sm:$0x1]  ;;  %472 = vst.msk [vmem:[%s1592_s14 + $0x22] sm:$0x1] %vm433_vm0, %v468_v20 }
  0x71   : > { %473 = vst.msk [vmem:[%s1592_s14 + $0x32] sm:$0x1] %vm433_vm0, %v469_v21  ;;  %478 = vst.msk [vmem:[%s1594_s16 + $0x2] sm:$0x1] %vm433_vm0, %v474_v22  ;;  %v475_v23 = vld [vmem:[%s1581_s18 + $0x1d] sm:$0x1] }
  0x72   : > { %v476_v24 = vld [vmem:[%s1581_s18 + $0x2d] sm:$0x1]  ;;  %v477_v25 = vld [vmem:[%s1581_s18 + $0x3d] sm:$0x1]  ;;  %479 = vst.msk [vmem:[%s1594_s16 + $0x12] sm:$0x1] %vm433_vm0, %v475_v23 }
  0x73   : > { %480 = vst.msk [vmem:[%s1594_s16 + $0x22] sm:$0x1] %vm433_vm0, %v476_v24  ;;  %481 = vst.msk [vmem:[%s1594_s16 + $0x32] sm:$0x1] %vm433_vm0, %v477_v25  ;;  %v482_v26 = vld [vmem:[%s1590_s15 + $0xd] sm:$0x1] }
  0x74   : > { %v484_v27 = vld [vmem:[%s1572_s12 + $0xc] sm:$0x1]  ;;  %v485_v28 = vld [vmem:[%s1572_s12 + $0x1c] sm:$0x1]  ;;  %483 = vst.msk [vmem:[%s1596_s30 + $0x2] sm:$0x1] %vm433_vm0, %v482_v26 }
  0x75   : > { %488 = vst.msk [vmem:[%s1592_s14 + $0x3] sm:$0x1] %vm433_vm0, %v484_v27  ;;  %489 = vst.msk [vmem:[%s1592_s14 + $0x13] sm:$0x1] %vm433_vm0, %v485_v28  ;;  %v486_v29 = vld [vmem:[%s1572_s12 + $0x2c] sm:$0x1] }
  0x76   : > { %v487_v30 = vld [vmem:[%s1572_s12 + $0x3c] sm:$0x1]  ;;  %v492_v31 = vld [vmem:[%s1581_s18 + $0xc] sm:$0x1]  ;;  %490 = vst.msk [vmem:[%s1592_s14 + $0x23] sm:$0x1] %vm433_vm0, %v486_v29 }
  0x77   : > { %491 = vst.msk [vmem:[%s1592_s14 + $0x33] sm:$0x1] %vm433_vm0, %v487_v30  ;;  %496 = vst.msk [vmem:[%s1594_s16 + $0x3] sm:$0x1] %vm433_vm0, %v492_v31  ;;  %v493_v32 = vld [vmem:[%s1581_s18 + $0x1c] sm:$0x1] }
  0x78   : > { %v494_v33 = vld [vmem:[%s1581_s18 + $0x2c] sm:$0x1]  ;;  %v495_v34 = vld [vmem:[%s1581_s18 + $0x3c] sm:$0x1]  ;;  %497 = vst.msk [vmem:[%s1594_s16 + $0x13] sm:$0x1] %vm433_vm0, %v493_v32 }
  0x79   : > { %498 = vst.msk [vmem:[%s1594_s16 + $0x23] sm:$0x1] %vm433_vm0, %v494_v33  ;;  %499 = vst.msk [vmem:[%s1594_s16 + $0x33] sm:$0x1] %vm433_vm0, %v495_v34  ;;  %v500_v35 = vld [vmem:[%s1590_s15 + $0xc] sm:$0x1] }
  0x7a   : > { %v502_v36 = vld [vmem:[%s1572_s12 + $0xb] sm:$0x1]  ;;  %v503_v37 = vld [vmem:[%s1572_s12 + $0x1b] sm:$0x1]  ;;  %501 = vst.msk [vmem:[%s1596_s30 + $0x3] sm:$0x1] %vm433_vm0, %v500_v35 }
  0x7b   : > { %506 = vst.msk [vmem:[%s1592_s14 + $0x4] sm:$0x1] %vm433_vm0, %v502_v36  ;;  %507 = vst.msk [vmem:[%s1592_s14 + $0x14] sm:$0x1] %vm433_vm0, %v503_v37  ;;  %v504_v38 = vld [vmem:[%s1572_s12 + $0x2b] sm:$0x1] }
  0x7c   : > { %v505_v39 = vld [vmem:[%s1572_s12 + $0x3b] sm:$0x1]  ;;  %v510_v40 = vld [vmem:[%s1581_s18 + $0xb] sm:$0x1]  ;;  %508 = vst.msk [vmem:[%s1592_s14 + $0x24] sm:$0x1] %vm433_vm0, %v504_v38 }
  0x7d   : > { %509 = vst.msk [vmem:[%s1592_s14 + $0x34] sm:$0x1] %vm433_vm0, %v505_v39  ;;  %514 = vst.msk [vmem:[%s1594_s16 + $0x4] sm:$0x1] %vm433_vm0, %v510_v40  ;;  %v511_v41 = vld [vmem:[%s1581_s18 + $0x1b] sm:$0x1] }
  0x7e   : > { %v512_v42 = vld [vmem:[%s1581_s18 + $0x2b] sm:$0x1]  ;;  %v513_v43 = vld [vmem:[%s1581_s18 + $0x3b] sm:$0x1]  ;;  %515 = vst.msk [vmem:[%s1594_s16 + $0x14] sm:$0x1] %vm433_vm0, %v511_v41 }
  0x7f   : > { %516 = vst.msk [vmem:[%s1594_s16 + $0x24] sm:$0x1] %vm433_vm0, %v512_v42  ;;  %517 = vst.msk [vmem:[%s1594_s16 + $0x34] sm:$0x1] %vm433_vm0, %v513_v43  ;;  %v518_v44 = vld [vmem:[%s1590_s15 + $0xb] sm:$0x1] }
  0x80   : > { %v520_v45 = vld [vmem:[%s1572_s12 + $0xa] sm:$0x1]  ;;  %v521_v46 = vld [vmem:[%s1572_s12 + $0x1a] sm:$0x1]  ;;  %519 = vst.msk [vmem:[%s1596_s30 + $0x4] sm:$0x1] %vm433_vm0, %v518_v44 }
  0x81   : > { %524 = vst.msk [vmem:[%s1592_s14 + $0x5] sm:$0x1] %vm433_vm0, %v520_v45  ;;  %525 = vst.msk [vmem:[%s1592_s14 + $0x15] sm:$0x1] %vm433_vm0, %v521_v46  ;;  %v522_v47 = vld [vmem:[%s1572_s12 + $0x2a] sm:$0x1] }
  0x82   : > { %v523_v48 = vld [vmem:[%s1572_s12 + $0x3a] sm:$0x1]  ;;  %v528_v49 = vld [vmem:[%s1581_s18 + $0xa] sm:$0x1]  ;;  %526 = vst.msk [vmem:[%s1592_s14 + $0x25] sm:$0x1] %vm433_vm0, %v522_v47 }
  0x83   : > { %527 = vst.msk [vmem:[%s1592_s14 + $0x35] sm:$0x1] %vm433_vm0, %v523_v48  ;;  %532 = vst.msk [vmem:[%s1594_s16 + $0x5] sm:$0x1] %vm433_vm0, %v528_v49  ;;  %v529_v50 = vld [vmem:[%s1581_s18 + $0x1a] sm:$0x1] }
  0x84   : > { %v530_v51 = vld [vmem:[%s1581_s18 + $0x2a] sm:$0x1]  ;;  %v531_v52 = vld [vmem:[%s1581_s18 + $0x3a] sm:$0x1]  ;;  %533 = vst.msk [vmem:[%s1594_s16 + $0x15] sm:$0x1] %vm433_vm0, %v529_v50 }
  0x85   : > { %534 = vst.msk [vmem:[%s1594_s16 + $0x25] sm:$0x1] %vm433_vm0, %v530_v51  ;;  %535 = vst.msk [vmem:[%s1594_s16 + $0x35] sm:$0x1] %vm433_vm0, %v531_v52  ;;  %v536_v53 = vld [vmem:[%s1590_s15 + $0xa] sm:$0x1] }
  0x86   : > { %v538_v54 = vld [vmem:[%s1572_s12 + $0x9] sm:$0x1]  ;;  %v539_v55 = vld [vmem:[%s1572_s12 + $0x19] sm:$0x1]  ;;  %537 = vst.msk [vmem:[%s1596_s30 + $0x5] sm:$0x1] %vm433_vm0, %v536_v53 }
  0x87   : > { %542 = vst.msk [vmem:[%s1592_s14 + $0x6] sm:$0x1] %vm433_vm0, %v538_v54  ;;  %543 = vst.msk [vmem:[%s1592_s14 + $0x16] sm:$0x1] %vm433_vm0, %v539_v55  ;;  %v540_v56 = vld [vmem:[%s1572_s12 + $0x29] sm:$0x1] }
  0x88   : > { %v541_v57 = vld [vmem:[%s1572_s12 + $0x39] sm:$0x1]  ;;  %v546_v58 = vld [vmem:[%s1581_s18 + $0x9] sm:$0x1]  ;;  %544 = vst.msk [vmem:[%s1592_s14 + $0x26] sm:$0x1] %vm433_vm0, %v540_v56 }
  0x89   : > { %545 = vst.msk [vmem:[%s1592_s14 + $0x36] sm:$0x1] %vm433_vm0, %v541_v57  ;;  %550 = vst.msk [vmem:[%s1594_s16 + $0x6] sm:$0x1] %vm433_vm0, %v546_v58  ;;  %v547_v59 = vld [vmem:[%s1581_s18 + $0x19] sm:$0x1] }
  0x8a   : > { %v548_v60 = vld [vmem:[%s1581_s18 + $0x29] sm:$0x1]  ;;  %v549_v61 = vld [vmem:[%s1581_s18 + $0x39] sm:$0x1]  ;;  %551 = vst.msk [vmem:[%s1594_s16 + $0x16] sm:$0x1] %vm433_vm0, %v547_v59 }
  0x8b   : > { %552 = vst.msk [vmem:[%s1594_s16 + $0x26] sm:$0x1] %vm433_vm0, %v548_v60  ;;  %553 = vst.msk [vmem:[%s1594_s16 + $0x36] sm:$0x1] %vm433_vm0, %v549_v61  ;;  %v554_v62 = vld [vmem:[%s1590_s15 + $0x9] sm:$0x1] }
  0x8c   : > { %v556_v63 = vld [vmem:[%s1572_s12 + $0x8] sm:$0x1]  ;;  %v557_v0 = vld [vmem:[%s1572_s12 + $0x18] sm:$0x1]  ;;  %555 = vst.msk [vmem:[%s1596_s30 + $0x6] sm:$0x1] %vm433_vm0, %v554_v62 }
  0x8d   : > { %560 = vst.msk [vmem:[%s1592_s14 + $0x7] sm:$0x1] %vm433_vm0, %v556_v63  ;;  %561 = vst.msk [vmem:[%s1592_s14 + $0x17] sm:$0x1] %vm433_vm0, %v557_v0  ;;  %v558_v1 = vld [vmem:[%s1572_s12 + $0x28] sm:$0x1] }
  0x8e   : > { %v559_v2 = vld [vmem:[%s1572_s12 + $0x38] sm:$0x1]  ;;  %v564_v3 = vld [vmem:[%s1581_s18 + $0x8] sm:$0x1]  ;;  %562 = vst.msk [vmem:[%s1592_s14 + $0x27] sm:$0x1] %vm433_vm0, %v558_v1 }
  0x8f   : > { %563 = vst.msk [vmem:[%s1592_s14 + $0x37] sm:$0x1] %vm433_vm0, %v559_v2  ;;  %568 = vst.msk [vmem:[%s1594_s16 + $0x7] sm:$0x1] %vm433_vm0, %v564_v3  ;;  %v565_v4 = vld [vmem:[%s1581_s18 + $0x18] sm:$0x1] }
  0x90   : > { %v566_v5 = vld [vmem:[%s1581_s18 + $0x28] sm:$0x1]  ;;  %v567_v6 = vld [vmem:[%s1581_s18 + $0x38] sm:$0x1]  ;;  %569 = vst.msk [vmem:[%s1594_s16 + $0x17] sm:$0x1] %vm433_vm0, %v565_v4 }
  0x91   : > { %570 = vst.msk [vmem:[%s1594_s16 + $0x27] sm:$0x1] %vm433_vm0, %v566_v5  ;;  %571 = vst.msk [vmem:[%s1594_s16 + $0x37] sm:$0x1] %vm433_vm0, %v567_v6  ;;  %v572_v7 = vld [vmem:[%s1590_s15 + $0x8] sm:$0x1] }
  0x92   : > { %v574_v8 = vld [vmem:[%s1572_s12 + $0x7] sm:$0x1]  ;;  %v575_v9 = vld [vmem:[%s1572_s12 + $0x17] sm:$0x1]  ;;  %573 = vst.msk [vmem:[%s1596_s30 + $0x7] sm:$0x1] %vm433_vm0, %v572_v7 }
  0x93   : > { %578 = vst.msk [vmem:[%s1592_s14 + $0x8] sm:$0x1] %vm433_vm0, %v574_v8  ;;  %579 = vst.msk [vmem:[%s1592_s14 + $0x18] sm:$0x1] %vm433_vm0, %v575_v9  ;;  %v576_v10 = vld [vmem:[%s1572_s12 + $0x27] sm:$0x1] }
  0x94   : > { %v577_v11 = vld [vmem:[%s1572_s12 + $0x37] sm:$0x1]  ;;  %v582_v12 = vld [vmem:[%s1581_s18 + $0x7] sm:$0x1]  ;;  %580 = vst.msk [vmem:[%s1592_s14 + $0x28] sm:$0x1] %vm433_vm0, %v576_v10 }
  0x95   : > { %581 = vst.msk [vmem:[%s1592_s14 + $0x38] sm:$0x1] %vm433_vm0, %v577_v11  ;;  %586 = vst.msk [vmem:[%s1594_s16 + $0x8] sm:$0x1] %vm433_vm0, %v582_v12  ;;  %v583_v13 = vld [vmem:[%s1581_s18 + $0x17] sm:$0x1] }
  0x96   : > { %v584_v14 = vld [vmem:[%s1581_s18 + $0x27] sm:$0x1]  ;;  %v585_v15 = vld [vmem:[%s1581_s18 + $0x37] sm:$0x1]  ;;  %587 = vst.msk [vmem:[%s1594_s16 + $0x18] sm:$0x1] %vm433_vm0, %v583_v13 }
  0x97   : > { %588 = vst.msk [vmem:[%s1594_s16 + $0x28] sm:$0x1] %vm433_vm0, %v584_v14  ;;  %589 = vst.msk [vmem:[%s1594_s16 + $0x38] sm:$0x1] %vm433_vm0, %v585_v15  ;;  %v590_v16 = vld [vmem:[%s1590_s15 + $0x7] sm:$0x1] }
  0x98   : > { %v592_v17 = vld [vmem:[%s1572_s12 + $0x6] sm:$0x1]  ;;  %v593_v18 = vld [vmem:[%s1572_s12 + $0x16] sm:$0x1]  ;;  %591 = vst.msk [vmem:[%s1596_s30 + $0x8] sm:$0x1] %vm433_vm0, %v590_v16 }
  0x99   : > { %596 = vst.msk [vmem:[%s1592_s14 + $0x9] sm:$0x1] %vm433_vm0, %v592_v17  ;;  %597 = vst.msk [vmem:[%s1592_s14 + $0x19] sm:$0x1] %vm433_vm0, %v593_v18  ;;  %v594_v19 = vld [vmem:[%s1572_s12 + $0x26] sm:$0x1] }
  0x9a   : > { %v595_v20 = vld [vmem:[%s1572_s12 + $0x36] sm:$0x1]  ;;  %v600_v21 = vld [vmem:[%s1581_s18 + $0x6] sm:$0x1]  ;;  %598 = vst.msk [vmem:[%s1592_s14 + $0x29] sm:$0x1] %vm433_vm0, %v594_v19 }
  0x9b   : > { %599 = vst.msk [vmem:[%s1592_s14 + $0x39] sm:$0x1] %vm433_vm0, %v595_v20  ;;  %604 = vst.msk [vmem:[%s1594_s16 + $0x9] sm:$0x1] %vm433_vm0, %v600_v21  ;;  %v601_v22 = vld [vmem:[%s1581_s18 + $0x16] sm:$0x1] }
  0x9c   : > { %v602_v23 = vld [vmem:[%s1581_s18 + $0x26] sm:$0x1]  ;;  %v603_v24 = vld [vmem:[%s1581_s18 + $0x36] sm:$0x1]  ;;  %605 = vst.msk [vmem:[%s1594_s16 + $0x19] sm:$0x1] %vm433_vm0, %v601_v22 }
  0x9d   : > { %606 = vst.msk [vmem:[%s1594_s16 + $0x29] sm:$0x1] %vm433_vm0, %v602_v23  ;;  %607 = vst.msk [vmem:[%s1594_s16 + $0x39] sm:$0x1] %vm433_vm0, %v603_v24  ;;  %v608_v25 = vld [vmem:[%s1590_s15 + $0x6] sm:$0x1] }
  0x9e   : > { %v610_v26 = vld [vmem:[%s1572_s12 + $0x5] sm:$0x1]  ;;  %v611_v27 = vld [vmem:[%s1572_s12 + $0x15] sm:$0x1]  ;;  %609 = vst.msk [vmem:[%s1596_s30 + $0x9] sm:$0x1] %vm433_vm0, %v608_v25 }
  0x9f   : > { %614 = vst.msk [vmem:[%s1592_s14 + $0xa] sm:$0x1] %vm433_vm0, %v610_v26  ;;  %615 = vst.msk [vmem:[%s1592_s14 + $0x1a] sm:$0x1] %vm433_vm0, %v611_v27  ;;  %v612_v28 = vld [vmem:[%s1572_s12 + $0x25] sm:$0x1] }
  0xa0   : > { %v613_v29 = vld [vmem:[%s1572_s12 + $0x35] sm:$0x1]  ;;  %v618_v30 = vld [vmem:[%s1581_s18 + $0x5] sm:$0x1]  ;;  %616 = vst.msk [vmem:[%s1592_s14 + $0x2a] sm:$0x1] %vm433_vm0, %v612_v28 }
  0xa1   : > { %617 = vst.msk [vmem:[%s1592_s14 + $0x3a] sm:$0x1] %vm433_vm0, %v613_v29  ;;  %622 = vst.msk [vmem:[%s1594_s16 + $0xa] sm:$0x1] %vm433_vm0, %v618_v30  ;;  %v619_v31 = vld [vmem:[%s1581_s18 + $0x15] sm:$0x1] }
  0xa2   : > { %v620_v32 = vld [vmem:[%s1581_s18 + $0x25] sm:$0x1]  ;;  %v621_v33 = vld [vmem:[%s1581_s18 + $0x35] sm:$0x1]  ;;  %623 = vst.msk [vmem:[%s1594_s16 + $0x1a] sm:$0x1] %vm433_vm0, %v619_v31 }
  0xa3   : > { %624 = vst.msk [vmem:[%s1594_s16 + $0x2a] sm:$0x1] %vm433_vm0, %v620_v32  ;;  %625 = vst.msk [vmem:[%s1594_s16 + $0x3a] sm:$0x1] %vm433_vm0, %v621_v33  ;;  %v626_v34 = vld [vmem:[%s1590_s15 + $0x5] sm:$0x1] }
  0xa4   : > { %v628_v35 = vld [vmem:[%s1572_s12 + $0x4] sm:$0x1]  ;;  %v629_v36 = vld [vmem:[%s1572_s12 + $0x14] sm:$0x1]  ;;  %627 = vst.msk [vmem:[%s1596_s30 + $0xa] sm:$0x1] %vm433_vm0, %v626_v34 }
  0xa5   : > { %632 = vst.msk [vmem:[%s1592_s14 + $0xb] sm:$0x1] %vm433_vm0, %v628_v35  ;;  %633 = vst.msk [vmem:[%s1592_s14 + $0x1b] sm:$0x1] %vm433_vm0, %v629_v36  ;;  %v630_v37 = vld [vmem:[%s1572_s12 + $0x24] sm:$0x1] }
  0xa6   : > { %v631_v38 = vld [vmem:[%s1572_s12 + $0x34] sm:$0x1]  ;;  %v636_v39 = vld [vmem:[%s1581_s18 + $0x4] sm:$0x1]  ;;  %634 = vst.msk [vmem:[%s1592_s14 + $0x2b] sm:$0x1] %vm433_vm0, %v630_v37 }
  0xa7   : > { %635 = vst.msk [vmem:[%s1592_s14 + $0x3b] sm:$0x1] %vm433_vm0, %v631_v38  ;;  %640 = vst.msk [vmem:[%s1594_s16 + $0xb] sm:$0x1] %vm433_vm0, %v636_v39  ;;  %v637_v40 = vld [vmem:[%s1581_s18 + $0x14] sm:$0x1] }
  0xa8   : > { %v638_v41 = vld [vmem:[%s1581_s18 + $0x24] sm:$0x1]  ;;  %v639_v42 = vld [vmem:[%s1581_s18 + $0x34] sm:$0x1]  ;;  %641 = vst.msk [vmem:[%s1594_s16 + $0x1b] sm:$0x1] %vm433_vm0, %v637_v40 }
  0xa9   : > { %642 = vst.msk [vmem:[%s1594_s16 + $0x2b] sm:$0x1] %vm433_vm0, %v638_v41  ;;  %643 = vst.msk [vmem:[%s1594_s16 + $0x3b] sm:$0x1] %vm433_vm0, %v639_v42  ;;  %v644_v43 = vld [vmem:[%s1590_s15 + $0x4] sm:$0x1] }
  0xaa   : > { %v646_v44 = vld [vmem:[%s1572_s12 + $0x3] sm:$0x1]  ;;  %v647_v45 = vld [vmem:[%s1572_s12 + $0x13] sm:$0x1]  ;;  %645 = vst.msk [vmem:[%s1596_s30 + $0xb] sm:$0x1] %vm433_vm0, %v644_v43 }
  0xab   : > { %650 = vst.msk [vmem:[%s1592_s14 + $0xc] sm:$0x1] %vm433_vm0, %v646_v44  ;;  %651 = vst.msk [vmem:[%s1592_s14 + $0x1c] sm:$0x1] %vm433_vm0, %v647_v45  ;;  %v648_v46 = vld [vmem:[%s1572_s12 + $0x23] sm:$0x1] }
  0xac   : > { %v649_v47 = vld [vmem:[%s1572_s12 + $0x33] sm:$0x1]  ;;  %v654_v48 = vld [vmem:[%s1581_s18 + $0x3] sm:$0x1]  ;;  %652 = vst.msk [vmem:[%s1592_s14 + $0x2c] sm:$0x1] %vm433_vm0, %v648_v46 }
  0xad   : > { %653 = vst.msk [vmem:[%s1592_s14 + $0x3c] sm:$0x1] %vm433_vm0, %v649_v47  ;;  %658 = vst.msk [vmem:[%s1594_s16 + $0xc] sm:$0x1] %vm433_vm0, %v654_v48  ;;  %v655_v49 = vld [vmem:[%s1581_s18 + $0x13] sm:$0x1] }
  0xae   : > { %v656_v50 = vld [vmem:[%s1581_s18 + $0x23] sm:$0x1]  ;;  %v657_v51 = vld [vmem:[%s1581_s18 + $0x33] sm:$0x1]  ;;  %659 = vst.msk [vmem:[%s1594_s16 + $0x1c] sm:$0x1] %vm433_vm0, %v655_v49 }
  0xaf   : > { %660 = vst.msk [vmem:[%s1594_s16 + $0x2c] sm:$0x1] %vm433_vm0, %v656_v50  ;;  %661 = vst.msk [vmem:[%s1594_s16 + $0x3c] sm:$0x1] %vm433_vm0, %v657_v51  ;;  %v662_v52 = vld [vmem:[%s1590_s15 + $0x3] sm:$0x1] }
  0xb0   : > { %v664_v53 = vld [vmem:[%s1572_s12 + $0x2] sm:$0x1]  ;;  %v665_v54 = vld [vmem:[%s1572_s12 + $0x12] sm:$0x1]  ;;  %663 = vst.msk [vmem:[%s1596_s30 + $0xc] sm:$0x1] %vm433_vm0, %v662_v52 }
  0xb1   : > { %668 = vst.msk [vmem:[%s1592_s14 + $0xd] sm:$0x1] %vm433_vm0, %v664_v53  ;;  %669 = vst.msk [vmem:[%s1592_s14 + $0x1d] sm:$0x1] %vm433_vm0, %v665_v54  ;;  %v666_v55 = vld [vmem:[%s1572_s12 + $0x22] sm:$0x1] }
  0xb2   : > { %v667_v56 = vld [vmem:[%s1572_s12 + $0x32] sm:$0x1]  ;;  %v672_v57 = vld [vmem:[%s1581_s18 + $0x2] sm:$0x1]  ;;  %670 = vst.msk [vmem:[%s1592_s14 + $0x2d] sm:$0x1] %vm433_vm0, %v666_v55 }
  0xb3   : > { %671 = vst.msk [vmem:[%s1592_s14 + $0x3d] sm:$0x1] %vm433_vm0, %v667_v56  ;;  %676 = vst.msk [vmem:[%s1594_s16 + $0xd] sm:$0x1] %vm433_vm0, %v672_v57  ;;  %v673_v58 = vld [vmem:[%s1581_s18 + $0x12] sm:$0x1] }
  0xb4   : > { %v674_v59 = vld [vmem:[%s1581_s18 + $0x22] sm:$0x1]  ;;  %v675_v60 = vld [vmem:[%s1581_s18 + $0x32] sm:$0x1]  ;;  %677 = vst.msk [vmem:[%s1594_s16 + $0x1d] sm:$0x1] %vm433_vm0, %v673_v58 }
  0xb5   : > { %678 = vst.msk [vmem:[%s1594_s16 + $0x2d] sm:$0x1] %vm433_vm0, %v674_v59  ;;  %679 = vst.msk [vmem:[%s1594_s16 + $0x3d] sm:$0x1] %vm433_vm0, %v675_v60  ;;  %v680_v61 = vld [vmem:[%s1590_s15 + $0x2] sm:$0x1] }
  0xb6   : > { %v682_v62 = vld [vmem:[%s1572_s12 + $0x1] sm:$0x1]  ;;  %v683_v63 = vld [vmem:[%s1572_s12 + $0x11] sm:$0x1]  ;;  %681 = vst.msk [vmem:[%s1596_s30 + $0xd] sm:$0x1] %vm433_vm0, %v680_v61 }
  0xb7   : > { %686 = vst.msk [vmem:[%s1592_s14 + $0xe] sm:$0x1] %vm433_vm0, %v682_v62  ;;  %687 = vst.msk [vmem:[%s1592_s14 + $0x1e] sm:$0x1] %vm433_vm0, %v683_v63  ;;  %v684_v0 = vld [vmem:[%s1572_s12 + $0x21] sm:$0x1] }
  0xb8   : > { %v685_v1 = vld [vmem:[%s1572_s12 + $0x31] sm:$0x1]  ;;  %v690_v2 = vld [vmem:[%s1581_s18 + $0x1] sm:$0x1]  ;;  %688 = vst.msk [vmem:[%s1592_s14 + $0x2e] sm:$0x1] %vm433_vm0, %v684_v0 }
  0xb9   : > { %689 = vst.msk [vmem:[%s1592_s14 + $0x3e] sm:$0x1] %vm433_vm0, %v685_v1  ;;  %694 = vst.msk [vmem:[%s1594_s16 + $0xe] sm:$0x1] %vm433_vm0, %v690_v2  ;;  %v691_v3 = vld [vmem:[%s1581_s18 + $0x11] sm:$0x1] }
  0xba   : > { %v692_v4 = vld [vmem:[%s1581_s18 + $0x21] sm:$0x1]  ;;  %v693_v5 = vld [vmem:[%s1581_s18 + $0x31] sm:$0x1]  ;;  %695 = vst.msk [vmem:[%s1594_s16 + $0x1e] sm:$0x1] %vm433_vm0, %v691_v3 }
  0xbb   : > { %696 = vst.msk [vmem:[%s1594_s16 + $0x2e] sm:$0x1] %vm433_vm0, %v692_v4  ;;  %697 = vst.msk [vmem:[%s1594_s16 + $0x3e] sm:$0x1] %vm433_vm0, %v693_v5  ;;  %v698_v6 = vld [vmem:[%s1590_s15 + $0x1] sm:$0x1] }
  0xbc   : > { %v700_v7 = vld [vmem:[%s1572_s12] sm:$0x1]  ;;  %v701_v8 = vld [vmem:[%s1572_s12 + $0x10] sm:$0x1]  ;;  %699 = vst.msk [vmem:[%s1596_s30 + $0xe] sm:$0x1] %vm433_vm0, %v698_v6 }
  0xbd   : > { %704 = vst.msk [vmem:[%s1592_s14 + $0xf] sm:$0x1] %vm433_vm0, %v700_v7  ;;  %705 = vst.msk [vmem:[%s1592_s14 + $0x1f] sm:$0x1] %vm433_vm0, %v701_v8  ;;  %v702_v9 = vld [vmem:[%s1572_s12 + $0x20] sm:$0x1] }
  0xbe   : > { %v703_v10 = vld [vmem:[%s1572_s12 + $0x30] sm:$0x1]  ;;  %v708_v11 = vld [vmem:[%s1581_s18] sm:$0x1]  ;;  %706 = vst.msk [vmem:[%s1592_s14 + $0x2f] sm:$0x1] %vm433_vm0, %v702_v9 }
  0xbf   : > { %707 = vst.msk [vmem:[%s1592_s14 + $0x3f] sm:$0x1] %vm433_vm0, %v703_v10  ;;  %712 = vst.msk [vmem:[%s1594_s16 + $0xf] sm:$0x1] %vm433_vm0, %v708_v11  ;;  %v709_v12 = vld [vmem:[%s1581_s18 + $0x10] sm:$0x1] }
  0xc0   : > { %v710_v13 = vld [vmem:[%s1581_s18 + $0x20] sm:$0x1]  ;;  %v711_v14 = vld [vmem:[%s1581_s18 + $0x30] sm:$0x1]  ;;  %713 = vst.msk [vmem:[%s1594_s16 + $0x1f] sm:$0x1] %vm433_vm0, %v709_v12 }
  0xc1   : > { %714 = vst.msk [vmem:[%s1594_s16 + $0x2f] sm:$0x1] %vm433_vm0, %v710_v13  ;;  %715 = vst.msk [vmem:[%s1594_s16 + $0x3f] sm:$0x1] %vm433_vm0, %v711_v14  ;;  %v716_v15 = vld [vmem:[%s1590_s15] sm:$0x1] }
  0xc2   : > { %717 = vst.msk [vmem:[%s1596_s30 + $0xf] sm:$0x1] %vm433_vm0, %v716_v15 }
  0xc3 PF: > { %p1045_p8 = scmp.gt.s32.totalorder %s1588_s8, 0 }
  0xc5   : > { %721 = sbr.rel (%p1045_p8) target bundleno = 212 (0xd4), region = 52 }
  0xca   : > { %v722_v16 = vld [vmem:[%s1572_s12] sm:$0xff]  ;;  %vm730_vm1 = vcmask 130048   ;;  %v723_v17 = vld [vmem:[%s1572_s12 + $0x8] sm:$0xff]  ;;  %v724_v18 = vld [vmem:[%s1572_s12 + $0x10] sm:$0xff] }
  0xcb   : > { %731 = vst.msk [vmem:[%s1592_s14] sm:$0xff] %vm730_vm1, %v722_v16  ;;  %732 = vst.msk [vmem:[%s1592_s14 + $0x8] sm:$0xff] %vm730_vm1, %v723_v17  ;;  %v725_v19 = vld [vmem:[%s1572_s12 + $0x18] sm:$0xff]  ;;  %v726_v20 = vld [vmem:[%s1572_s12 + $0x20] sm:$0xff] }
  0xcc   : > { %733 = vst.msk [vmem:[%s1592_s14 + $0x10] sm:$0xff] %vm730_vm1, %v724_v18  ;;  %v727_v21 = vld [vmem:[%s1572_s12 + $0x28] sm:$0xff]  ;;  %734 = vst.msk [vmem:[%s1592_s14 + $0x18] sm:$0xff] %vm730_vm1, %v725_v19  ;;  %v728_v22 = vld [vmem:[%s1572_s12 + $0x30] sm:$0xff] }
  0xcd   : > { %735 = vst.msk [vmem:[%s1592_s14 + $0x20] sm:$0xff] %vm730_vm1, %v726_v20  ;;  %736 = vst.msk [vmem:[%s1592_s14 + $0x28] sm:$0xff] %vm730_vm1, %v727_v21  ;;  %v729_v23 = vld [vmem:[%s1572_s12 + $0x38] sm:$0xff]  ;;  %v739_v24 = vld [vmem:[%s1581_s18] sm:$0xff] }
  0xce   : > { %737 = vst.msk [vmem:[%s1592_s14 + $0x30] sm:$0xff] %vm730_vm1, %v728_v22  ;;  %738 = vst.msk [vmem:[%s1592_s14 + $0x38] sm:$0xff] %vm730_vm1, %v729_v23  ;;  %v740_v25 = vld [vmem:[%s1581_s18 + $0x8] sm:$0xff]  ;;  %v741_v26 = vld [vmem:[%s1581_s18 + $0x10] sm:$0xff] }
  0xcf   : > { %747 = vst.msk [vmem:[%s1594_s16] sm:$0xff] %vm730_vm1, %v739_v24  ;;  %v742_v27 = vld [vmem:[%s1581_s18 + $0x18] sm:$0xff]  ;;  %748 = vst.msk [vmem:[%s1594_s16 + $0x8] sm:$0xff] %vm730_vm1, %v740_v25  ;;  %v743_v28 = vld [vmem:[%s1581_s18 + $0x20] sm:$0xff] }
  0xd0   : > { %749 = vst.msk [vmem:[%s1594_s16 + $0x10] sm:$0xff] %vm730_vm1, %v741_v26  ;;  %750 = vst.msk [vmem:[%s1594_s16 + $0x18] sm:$0xff] %vm730_vm1, %v742_v27  ;;  %v744_v29 = vld [vmem:[%s1581_s18 + $0x28] sm:$0xff]  ;;  %v745_v30 = vld [vmem:[%s1581_s18 + $0x30] sm:$0xff] }
  0xd1   : > { %751 = vst.msk [vmem:[%s1594_s16 + $0x20] sm:$0xff] %vm730_vm1, %v743_v28  ;;  %752 = vst.msk [vmem:[%s1594_s16 + $0x28] sm:$0xff] %vm730_vm1, %v744_v29  ;;  %v746_v31 = vld [vmem:[%s1581_s18 + $0x38] sm:$0xff]  ;;  %v755_v32 = vld [vmem:[%s1590_s15] sm:$0xff] }
  0xd2   : > { %753 = vst.msk [vmem:[%s1594_s16 + $0x30] sm:$0xff] %vm730_vm1, %v745_v30  ;;  %v756_v33 = vld [vmem:[%s1590_s15 + $0x8] sm:$0xff]  ;;  %754 = vst.msk [vmem:[%s1594_s16 + $0x38] sm:$0xff] %vm730_vm1, %v746_v31 }
  0xd3   : > { %757 = vst.msk [vmem:[%s1596_s30] sm:$0xff] %vm730_vm1, %v755_v32  ;;  %758 = vst.msk [vmem:[%s1596_s30 + $0x8] sm:$0xff] %vm730_vm1, %v756_v33 }
  0xd4 PF: > { %s1060_s10 = sshll.u32 %s1365_s26, 10  ;;  %s803_s13 = sshll.u32 %s1594_s16, 4  ;;  %s2095_s13 = int_to_ptr.vmem [resolvable:$true] %s803_s13 }
  0xd5   : > { %s2092_s21 = scalar_lea.hbm %s2218_s5, %s1060_s10  ;;  %s2099_s20 = scalar_lea.sflag [#allocation12], %s346_s17 }
  0xd6   : > { %s1233_s7 = scalar_lea.vmem %s2095_s13, 1024  ;;  %s1380_s1 = smov [#allocation11]  }
  0xd7   : > { %p1234_p3 = scmp.ne.s32.totalorder %s2095_s13, %s1233_s7  ;;  %s1237_s25 = sshll.u32 %s1380_s1, 4  ;;  %s1238_s25 = int_to_ptr.vmem [resolvable:$false] %s1237_s25 }
  0xd8   : > { %s1239_s12 = scalar_lea.vmem %s1238_s25, 2048  ;;  %p1240_p13 = scmp.lt.s32.totalorder %s2095_s13, %s1238_s25 }
  0xd9   : > { %p1235_p4 = pnand %p1234_p3, %p1478_p9  ;;  %p1241_p12 = scmp.lt.s32.totalorder %s1239_s12, %s1233_s7 }
  0xdb   : > { %p1236_p10 = pneg %p1235_p4  ;;  %p1242_p5 = por %p1241_p12, %p1240_p13 }
  0xdd   : > { %p1243_p1 = pnand %p1242_p5, %p1236_p10 }
  0xdf   : > { %1246 = shalt.err (!%p1243_p1)
}
  0xe0   : > { %s1247_s0 = scalar_lea.hbm %s2092_s21, 1024  ;;  %s1251_s18 = scalar_lea.hbm %s2218_s5, 2048 }
  0xe1   : > { %p1248_p2 = scmp.ne.s32.totalorder %s2092_s21, %s1247_s0  ;;  %p1252_p0 = scmp.lt.s32.totalorder %s2092_s21, %s2218_s5 }
  0xe2   : > { %p1253_p8 = scmp.lt.s32.totalorder %s1251_s18, %s1247_s0 }
  0xe3   : > { %p1249_p6 = pnand %p1248_p2, %p1478_p9 }
  0xe4   : > { %p1254_p3 = por %p1253_p8, %p1252_p0 }
  0xe5   : > { %p1250_p7 = pneg %p1249_p6 }
  0xe7   : > { %p1255_p4 = pnand %p1254_p3, %p1250_p7 }
  0xe9   : > { %1258 = shalt.err (!%p1255_p4)
}
  0xea   : > { %s1381_s15 = smov 128   ;;  %s1382_s16 = smov 8  }
  0xeb   : > { %1070 = dma.vmem_to_hbm [thread:$0]  (%p1478_p9), %s2095_s13, 1024, %s2092_s21, %s2099_s20, %s1381_s15, %s1381_s15, %s1382_s16  }
  0xec   : > { %s2130_s7 = scalar_lea.hbm %s2217_s4, %s1060_s10  ;;  %s785_s1 = sshll.u32 %s1592_s14, 4  ;;  %s2133_s1 = int_to_ptr.vmem [resolvable:$true] %s785_s1 }
  0xed   : > { %s1062_s25 = sshll.u32 %s1365_s26, 8  ;;  %s760_s12 = scalar_lea.sflag [#allocation6], %s1568_s2 }
  0xee   : > { %s1259_s0 = scalar_lea.vmem %s2133_s1, 1024  ;;  %s1383_s21 = smov [#allocation10]  }
  0xef   : > { %p1260_p10 = scmp.ne.s32.totalorder %s2133_s1, %s1259_s0  ;;  %s1263_s13 = sshll.u32 %s1383_s21, 4  ;;  %s1264_s13 = int_to_ptr.vmem [resolvable:$false] %s1263_s13 }
  0xf0   : > { %s1265_s17 = scalar_lea.vmem %s1264_s13, 2048  ;;  %p1266_p5 = scmp.lt.s32.totalorder %s2133_s1, %s1264_s13 }
  0xf1   : > { %p1261_p13 = pnand %p1260_p10, %p1478_p9  ;;  %p1267_p1 = scmp.lt.s32.totalorder %s1265_s17, %s1259_s0 }
  0xf3   : > { %p1262_p12 = pneg %p1261_p13  ;;  %p1268_p2 = por %p1267_p1, %p1266_p5 }
  0xf5   : > { %p1269_p6 = pnand %p1268_p2, %p1262_p12 }
  0xf7   : > { %1272 = shalt.err (!%p1269_p6)
}
  0xf8   : > { %s1273_s14 = scalar_lea.hbm %s2130_s7, 1024  ;;  %s1277_s9 = scalar_lea.hbm %s2217_s4, 2048 }
  0xf9   : > { %p1274_p7 = scmp.ne.s32.totalorder %s2130_s7, %s1273_s14  ;;  %p1278_p3 = scmp.lt.s32.totalorder %s2130_s7, %s2217_s4 }
  0xfa   : > { %p1279_p4 = scmp.lt.s32.totalorder %s1277_s9, %s1273_s14 }
  0xfb   : > { %p1275_p0 = pnand %p1274_p7, %p1478_p9 }
  0xfc   : > { %p1280_p10 = por %p1279_p4, %p1278_p3 }
  0xfd   : > { %p1276_p8 = pneg %p1275_p0 }
  0xff   : > { %p1281_p13 = pnand %p1280_p10, %p1276_p8 }
 0x101   : > { %1284 = shalt.err (!%p1281_p13)
}
 0x102   : > { %1069 = dma.vmem_to_hbm [thread:$0]  (%p1478_p9), %s2133_s1, 1024, %s2130_s7, %s760_s12, %s1381_s15, %s1381_s15, %s1382_s16  }
 0x103   : > { %s2165_s19 = scalar_lea.hbm %s2219_s6, %s1062_s25  ;;  %s821_s0 = sshll.u32 %s1596_s30, 4  ;;  %s822_s0 = int_to_ptr.vmem [resolvable:$true] %s821_s0 }
 0x104   : > { %s1285_s21 = scalar_lea.vmem %s822_s0, 256  ;;  %s1384_s13 = smov [#allocation13]  }
 0x105   : > { %p1286_p12 = scmp.ne.s32.totalorder %s822_s0, %s1285_s21  ;;  %s1289_s17 = sshll.u32 %s1384_s13, 4  ;;  %s1290_s17 = int_to_ptr.vmem [resolvable:$false] %s1289_s17 }
 0x106   : > { %s1291_s14 = scalar_lea.vmem %s1290_s17, 512  ;;  %p1292_p2 = scmp.lt.s32.totalorder %s822_s0, %s1290_s17 }
 0x107   : > { %p1287_p5 = pnand %p1286_p12, %p1478_p9  ;;  %p1293_p6 = scmp.lt.s32.totalorder %s1291_s14, %s1285_s21 }
 0x109   : > { %p1288_p1 = pneg %p1287_p5  ;;  %p1294_p7 = por %p1293_p6, %p1292_p2 }
 0x10b   : > { %p1295_p0 = pnand %p1294_p7, %p1288_p1 }
 0x10d   : > { %1298 = shalt.err (!%p1295_p0)
}
 0x10e   : > { %s1299_s26 = scalar_lea.hbm %s2165_s19, 256  ;;  %s1303_s1 = scalar_lea.hbm %s2219_s6, 512 }
 0x10f   : > { %p1300_p8 = scmp.ne.s32.totalorder %s2165_s19, %s1299_s26  ;;  %p1304_p10 = scmp.lt.s32.totalorder %s2165_s19, %s2219_s6 }
 0x110   : > { %p1305_p13 = scmp.lt.s32.totalorder %s1303_s1, %s1299_s26 }
 0x111   : > { %p1301_p3 = pnand %p1300_p8, %p1478_p9 }
 0x112   : > { %p1306_p12 = por %p1305_p13, %p1304_p10 }
 0x113   : > { %p1302_p4 = pneg %p1301_p3 }
 0x115   : > { %p1307_p5 = pnand %p1306_p12, %p1302_p4 }
 0x117   : > { %1310 = shalt.err (!%p1307_p5)
}
 0x118   : > { %1071 = dma.vmem_to_hbm [thread:$0]  (%p1478_p9), %s822_s0, 256, %s2165_s19, %s2099_s20, %s1381_s15, %s1381_s15, %s1382_s16  }
 0x119 PF: > { %s836_s10 = sand.u32 1, %s1353_s23   ;;  %p2242_p1 = scmp.ge.s32.totalorder %s1373_s28, 2 }
 0x11a   : > { %s837_s9 = scalar_lea.sflag [#allocation6], %s836_s10 }
 0x11b   : > { %p1086_p2 = pnand %p2242_p1, %p1487_p11 }
 0x11d   : > { %p1087_p6 = pneg %p1086_p2 }
 0x11f   : > { %1344 = dma.done.wait (%p1087_p6), %s837_s9, 1024  }
 0x120   : > { %1346 = vsyncadd (%p1087_p6), %s837_s9, 4294966272  ;;  %s2243_s11 = sadd.s32 4294967294, %s1373_s28  }
 0x121   : > { %s845_s18 = sand.u32 1, %s2243_s11  }
 0x122   : > { %s846_s29 = scalar_lea.sflag [#allocation12], %s845_s18 }
 0x123   : > { %1348 = dma.done.wait (%p1087_p6), %s846_s29, 1280  }
 0x124   : > { %1350 = vsyncadd (%p1087_p6), %s846_s29, 4294966016  ;;  %s30_s28 = sadd.s32 1, %s1373_s28   ;;  %s2244_s20 = sld [smem:[#allocation18_spill]] }
 0x125   : > { %p27_p9 = scmp.ge.s32.totalorder %s30_s28, 4   ;;  %s2245_s25 = sld [smem:[#allocation20_spill]] }
 0x126   : > { %s2246_s15 = sld [smem:[#allocation19_spill]]  ;;  %s2247_s23 = smov %s1357_s24 }
 0x127   : > { %s2249_s26 = smov %s1369_s27 }
 0x128   :  { %29 = sbr.rel (!%p27_p9) target bundleno = 14 (0xe), region = 141 }
 0x12a   : > { %s2248_s24 = smov %s2244_s20 }
 0x12c   : > { %s2250_s27 = smov %s2246_s15 }
 0x12d   :  { %860 = vsyncpa [#allocation5], 1 }
 0x12e   :  { %862 = vsyncpa [#allocation5 + $0x1], 1 }
 0x12f   :  { %863 = vsyncpa [#allocation8], 1 }
 0x130   :  { %865 = vsyncpa [#allocation8 + $0x1], 1 }
 0x131   :  { %866 = vsyncpa [#allocation6], 1 }
 0x132   :  { %868 = vsyncpa [#allocation6 + $0x1], 1 }
 0x133   :  { %869 = vsyncpa [#allocation12], 1 }
 0x134   :  { %871 = vsyncpa [#allocation12 + $0x1], 1 }

</bundles_post_ra>
